<compile_context>
chip_gen: v7x
topology: tpu7x:2x2x1
jax: 0.10.0
libtpu: 0.0.40
codegen_flags: <defaults>
</compile_context>

<pallas_src>
import functools

import jax
import jax.numpy as jnp
from jax.scipy.stats import norm
from jax.experimental import pallas as pl
from jax.experimental.pallas import tpu as pltpu


LANE = 128
MAX_L_TILE = 8192            # review: raise the tile cap well past 512 lanes
VMEM_TILE_BUDGET = 8 << 20   # keep per-step VMEM well under the 16 MiB (v5e) default


def _round_up(v, m):
    return ((v + m - 1) // m) * m


def _choose_ltile(lout, batch, c_in, ksize, n_experts, c_out):
    """Pick the output-position tile width (lanes) from a VMEM budget."""
    lpad = _round_up(max(lout, 1), LANE)
    # Approx. per-output-lane VMEM bytes: bf16 patch-scratch column (Cin*K*2),
    # double-buffered bf16 window column (~2*Cin*2), f32 conv activations
    # (E*Cout*4), small f32 logits/outputs.
    per_lane = c_in * ksize * 2 + 2 * c_in * 2 + n_experts * c_out * 4 + 4 * n_experts + 8
    t = max(LANE, (VMEM_TILE_BUDGET // per_lane) // LANE * LANE)
    t = min(t, MAX_L_TILE, lpad)
    if batch == 1 and lpad >= 2 * LANE:
        # keep >= 2 grid steps so both v7x TensorCores are fed
        t = min(t, _round_up(lpad // 2, LANE))
    return t


# ----------------------------- Pallas kernel --------------------------------

def moe_experts_kernel(gates_ref, xwin_ref, w1_ref, b1_ref, wd_ref, bd_ref,
                       out_ref, patch_ref, *, n_experts, c_in, c_out, ksize,
                       ltile):
    """Fused ClsHead-expert step for one (batch, L-tile) grid cell.

    gates_ref : [B, E]            f32  SMEM  per-(batch, expert) gate scalars
    xwin_ref  : [1, Cin, Twin]    bf16       halo'd x window for this tile
    w1_ref    : [E*Cout, K*Cin]   bf16       all experts' conv1 weights, stacked
    b1_ref    : [E*Cout, 1]       f32        conv1 biases
    wd_ref    : [E, Cout, 1]      f32        w2[:,0,:]-w2[:,1,:]
    bd_ref    : [E, 1]            f32        b2[:,0]-b2[:,1]
    out_ref   : [1, T]            f32        gate-combined class-0 probability
    patch_ref : [K*Cin, T]        bf16       VMEM scratch for in-kernel im2col
    """
    b = pl.program_id(0)
    xw = xwin_ref[0]                                   # [Cin, Twin] bf16

    # In-kernel im2col (avoids the K=64x HBM read amplification of a
    # materialized patch slab):  patch[kk*Cin + c, t] = x[b, c, start + t + kk]
    for kk in range(ksize):
        patch_ref[kk * c_in:(kk + 1) * c_in, :] = xw[:, kk:kk + ltile]

    # Conv1d(kernel=K) for ALL experts in one stacked bf16 MXU matmul.
    h = jnp.dot(w1_ref[...], patch_ref[...],
                preferred_element_type=jnp.float32)    # [E*Cout, T]
    h = jnp.maximum(h + b1_ref[...], 0.0)              # bias + ReLU

    # Conv1d(Cout->2, k=1) + Softmax(dim=1) == sigmoid of the logit difference.
    # The block-diagonal second matmul is done as a VPU multiply + sublane
    # reduce instead of an f32 MXU pass.
    h = h.reshape(n_experts, c_out, ltile)             # [E, Cout, T]
    d = jnp.sum(h * wd_ref[...], axis=1) + bd_ref[...]  # [E, T]
    p0 = 0.5 * (1.0 + jnp.tanh(0.5 * d))               # sigmoid via one EUP tanh

    # Gate-weighted combine over experts; gates are per-batch scalars in SMEM.
    y0 = gates_ref[b, 0] * p0[0:1, :]
    for e in range(1, n_experts):
        y0 = y0 + gates_ref[b, e] * p0[e:e + 1, :]
    out_ref[...] = y0           # class 1 = 1 - y0, applied in the JAX epilogue


def run_experts_pallas(gates, xwin, w1m, b1v, wd, bd, *, batch, n_ltiles,
                       ltile, n_experts, c_in, c_out, ksize):
    """gates: [B, E] f32; xwin: [B*n_ltiles, Cin, Twin] bf16;
       w1m: [E*Cout, K*Cin] bf16; b1v: [E*Cout, 1]; wd: [E, Cout, 1]; bd: [E, 1]."""
    twin = ltile + ksize - 1
    ec = n_experts * c_out
    ck = ksize * c_in
    kern = functools.partial(moe_experts_kernel, n_experts=n_experts,
                             c_in=c_in, c_out=c_out, ksize=ksize, ltile=ltile)

    return pl.pallas_call(
        kern,
        out_shape=jax.ShapeDtypeStruct((1, batch * n_ltiles * ltile), jnp.float32),
        grid_spec=pltpu.PrefetchScalarGridSpec(
            num_scalar_prefetch=0,
            grid=(batch, n_ltiles),
            in_specs=[
                # tiny per-(batch, expert) gate table lives in SMEM (no HBM slab)
                pl.BlockSpec(memory_space=pltpu.MemorySpace.SMEM),
                # halo'd x window for this (b, j) tile
                pl.BlockSpec((1, c_in, twin),
                             lambda b, j: (b * n_ltiles + j, 0, 0)),
                # constant weights: single-buffered
                pl.BlockSpec((ec, ck), lambda b, j: (0, 0),
                             pipeline_mode=pl.Buffered(1)),
                pl.BlockSpec((ec, 1), lambda b, j: (0, 0),
                             pipeline_mode=pl.Buffered(1)),
                pl.BlockSpec((n_experts, c_out, 1), lambda b, j: (0, 0, 0),
                             pipeline_mode=pl.Buffered(1)),
                pl.BlockSpec((n_experts, 1), lambda b, j: (0, 0),
                             pipeline_mode=pl.Buffered(1)),
            ],
            out_specs=pl.BlockSpec((1, ltile),
                                   lambda b, j: (0, b * n_ltiles + j)),
            scratch_shapes=[pltpu.VMEM((ck, ltile), jnp.bfloat16)],
        ),
        # per-step working set is <= ~VMEM_TILE_BUDGET, well under the scoped
        # VMEM default on all chips, so no vmem_limit_bytes override is needed.
        compiler_params=pltpu.CompilerParams(
            dimension_semantics=("parallel", "parallel")),
    )(gates, xwin, w1m, b1v, wd, bd)


# ------------------------------- JAX glue ------------------------------------

def cv_squared(x):
    eps = 1e-10
    if x.shape[0] == 1:
        return jnp.zeros((), x.dtype)
    x = x.astype(jnp.float32)
    return jnp.var(x, ddof=1) / (jnp.mean(x) ** 2 + eps)


def _prob_in_top_k(clean, noisy, noise_stddev, noisy_top_values, k):
    batch = clean.shape[0]
    m = noisy_top_values.shape[1]
    flat = noisy_top_values.reshape(-1)
    pos_in = jnp.arange(batch) * m + k
    thr_in = flat[pos_in][:, None]
    is_in = noisy > thr_in
    thr_out = flat[pos_in - 1][:, None]
    # eval-mode guard: with train=False noise_stddev is 0; avoid NaN load/loss.
    safe_std = jnp.where(noise_stddev > 0, noise_stddev, 1.0)
    prob_if_in = norm.cdf((clean - thr_in) / safe_std)
    prob_if_out = norm.cdf((clean - thr_out) / safe_std)
    return jnp.where(is_in, prob_if_in, prob_if_out)


def noisy_top_k_gating(gate_x, w_gate, w_noise, noise_key, *, k, num_experts,
                       temperature, train=True, noise_epsilon=0.01):
    B = gate_x.shape[0]
    clean_logits = gate_x @ w_gate
    raw_noise_stddev = gate_x @ w_noise
    noise_stddev = (jax.nn.softplus(raw_noise_stddev) + noise_epsilon) * float(train)
    noisy_logits = clean_logits + jax.random.normal(
        noise_key, clean_logits.shape) * noise_stddev
    logits = jax.nn.softmax(noisy_logits / temperature, axis=1)

    m = min(k + 1, num_experts)
    top_logits, top_indices = jax.lax.top_k(logits, m)
    top_k_logits = top_logits[:, :k]
    top_k_indices = top_indices[:, :k]
    top_k_gates = jax.nn.softmax(top_k_logits, axis=1)   # sums to 1 per row
    gates = jnp.zeros_like(logits).at[
        jnp.arange(B)[:, None], top_k_indices].set(top_k_gates)
    # TODO(synk): self.usage buffer increment is a training-time side effect; skipped.

    if k < num_experts:
        load = _prob_in_top_k(clean_logits, noisy_logits, noise_stddev,
                              top_logits, k).sum(0)
    else:
        load = (gates > 0).sum(0).astype(jnp.float32)
    return gates, load


def moe_forward(x, params, noise_key, *, k, num_experts, temperature,
                train=True, loss_coef=0.01):
    """x: [B, Cin, L] (PyTorch NCL). Returns (y [B, 2, Lout], loss scalar)."""
    B, Cin, L = x.shape
    E, Cout, _, K = params["w1"].shape
    assert L >= K, "sequence must be at least as long as the conv kernel"
    Lout = L - K + 1

    # gating input: AdaptiveAvgPool1d((1,)) + flatten -> [B, Cin]
    gate_x = jnp.mean(x, axis=2)
    gates, load = noisy_top_k_gating(
        gate_x, params["w_gate"], params["w_noise"], noise_key,
        k=k, num_experts=num_experts, temperature=temperature, train=train)

    importance = gates.sum(0)
    loss = (cv_squared(importance) + cv_squared(load)) * loss_coef

    # ---- tile selection (VMEM-budget derived, lane-dense) --------------------
    ltile = _choose_ltile(Lout, B, Cin, K, E, Cout)
    n_ltiles = -(-Lout // ltile)
    lpad = n_ltiles * ltile
    twin = ltile + K - 1

    # Halo'd x windows (only ~K/ltile extra duplication vs x itself); the
    # K=64x im2col expansion happens inside the kernel, not in HBM.
    x_pad = jnp.pad(x, ((0, 0), (0, 0), (0, lpad + K - 1 - L)))
    win_idx = (jnp.arange(n_ltiles) * ltile)[:, None] + jnp.arange(twin)[None, :]
    xwin = x_pad[:, :, win_idx]                           # [B, Cin, nT, Twin]
    xwin = jnp.transpose(xwin, (0, 2, 1, 3)).reshape(B * n_ltiles, Cin, twin)
    xwin = xwin.astype(jnp.bfloat16)

    # Stacked / collapsed expert weights. Column order kk*Cin + c to match the
    # in-kernel patch assembly.
    w1m = jnp.transpose(params["w1"], (0, 1, 3, 2)).reshape(
        E * Cout, K * Cin).astype(jnp.bfloat16)
    b1v = params["b1"].reshape(E * Cout, 1).astype(jnp.float32)
    wd = (params["w2"][:, 0, :] - params["w2"][:, 1, :]).reshape(
        E, Cout, 1).astype(jnp.float32)
    bd = (params["b2"][:, 0] - params["b2"][:, 1]).reshape(E, 1).astype(jnp.float32)

    # TODO(synk): SparseDispatcher source not provided; combine implemented as
    # the gate-weighted sum over selected experts (dense-equivalent semantics).
    y0_flat = run_experts_pallas(gates.astype(jnp.float32), xwin, w1m, b1v, wd, bd,
                                 batch=B, n_ltiles=n_ltiles, ltile=ltile,
                                 n_experts=E, c_in=Cin, c_out=Cout, ksize=K)

    # Slice off padded positions FIRST, then use gates-sum-to-1: class1 = 1 - y0.
    y0 = y0_flat.reshape(B, lpad)[:, :Lout]
    y = jnp.stack([y0, 1.0 - y0], axis=1)                 # [B, 2, Lout]
    return y, loss


# pure-JAX f32 reference for the expert path (correctness check)
def experts_reference(gates, patches, w1, b1, w2, b2, B, Lout):
    E = w1.shape[0]
    out = 0.0
    for e in range(E):
        h = jnp.maximum(patches @ w1[e] + b1[e], 0.0)
        lg = h @ w2[e] + b2[e]
        sm = jax.nn.softmax(lg, axis=-1)
        g = jnp.repeat(gates[:, e], Lout)[:, None]
        out = out + g * sm
    return out


# ------------------------------- main ----------------------------------------

if __name__ == "__main__":
    # Small shapes consistent with ClsHead experts (Conv1d kernel_size=64):
    B, Cin, L = 2, 4, 95          # input_size=4, seq length 95 -> Lout = 32
    Cout = 8                      # output_size
    K = 64
    E, k_top, temperature = 4, 2, 1.0
    Lout = L - K + 1

    key = jax.random.PRNGKey(0)
    kx, kw1, kb1, kw2, kb2, knoise = jax.random.split(key, 6)

    x = jax.random.normal(kx, (B, Cin, L), jnp.float32)

    # Expert 0 weights, replicated across experts (module copies expert 0's
    # state_dict into all experts).
    w1_0 = jax.random.normal(kw1, (Cout, Cin, K), jnp.float32) * 0.05
    b1_0 = jax.random.normal(kb1, (Cout,), jnp.float32) * 0.05
    w2_0 = jax.random.normal(kw2, (2, Cout), jnp.float32) * 0.1
    b2_0 = jax.random.normal(kb2, (2,), jnp.float32) * 0.1

    params = {
        "w1": jnp.broadcast_to(w1_0, (E, Cout, Cin, K)),
        "b1": jnp.broadcast_to(b1_0, (E, Cout)),
        "w2": jnp.broadcast_to(w2_0, (E, 2, Cout)),
        "b2": jnp.broadcast_to(b2_0, (E, 2)),
        # nn.Parameter(torch.zeros(...)) in __init__:
        "w_gate": jnp.zeros((Cin, E), jnp.float32),
        "w_noise": jnp.zeros((Cin, E), jnp.float32),
    }

    # TODO(synk): ResBlock source (and thus the full MoEResNet54Doublev4
    # feature extractor) was not provided; this kernel covers the MoE forward
    # with ClsHead experts (Conv1d(k=64) -> ReLU -> Conv1d(k=1) -> Softmax).
    fwd = functools.partial(moe_forward, k=k_top, num_experts=E,
                            temperature=temperature, train=True,
                            loss_coef=0.01)
    y, loss = jax.jit(fwd)(x, params, knoise)
    jax.block_until_ready((y, loss))

    # Cross-check expert hot path against a pure-JAX f32 reference.
    gate_x = jnp.mean(x, axis=2)
    gates, _ = noisy_top_k_gating(gate_x, params["w_gate"], params["w_noise"],
                                  knoise, k=k_top, num_experts=E,
                                  temperature=temperature, train=True)
    idx = jnp.arange(Lout)[:, None] + jnp.arange(K)[None, :]
    patches = jnp.transpose(x[:, :, idx], (0, 2, 1, 3)).reshape(B * Lout, Cin * K)
    w1m = jnp.transpose(params["w1"].reshape(E, Cout, Cin * K), (0, 2, 1))
    b1m = params["b1"].reshape(E, 1, Cout)
    w2m = jnp.transpose(params["w2"].reshape(E, 2, Cout), (0, 2, 1))
    b2m = params["b2"].reshape(E, 1, 2)
    y_ref = experts_reference(gates, patches, w1m, b1m, w2m, b2m, B, Lout)
    y_ref = jnp.transpose(y_ref.reshape(B, Lout, 2), (0, 2, 1))

    assert y.shape == (B, 2, Lout)
    # bf16 matmul operands => compare at a loose tolerance
    assert jnp.allclose(y, y_ref, atol=1e-2, rtol=1e-2)
    assert jnp.isfinite(loss)
    print("KERNEL_OK")
</pallas_src>

<mosaic_0001>
module attributes {stable_mosaic.version = 11 : i64} {
  func.func @moe_experts_kernel(%arg0: i32, %arg1: i32, %arg2: memref<2x4xf32, #tpu.memory_space<smem>>, %arg3: memref<1x4x191xbf16, #tpu.memory_space<vmem>>, %arg4: memref<32x256xbf16, #tpu.memory_space<vmem>>, %arg5: memref<32x1xf32, #tpu.memory_space<vmem>>, %arg6: memref<4x8x1xf32, #tpu.memory_space<vmem>>, %arg7: memref<4x1xf32, #tpu.memory_space<vmem>>, %arg8: memref<1x128xf32, #tpu.memory_space<vmem>>, %arg9: memref<256x128xbf16, #tpu.memory_space<vmem>>) attributes {dimension_semantics = [#tpu.dimension_semantics<parallel>, #tpu.dimension_semantics<parallel>], iteration_bounds = array<i64: 2, 1>, scalar_prefetch = 0 : i64, scratch_operands = 1 : i64, tpu.core_type = #tpu.core_type<tc>, window_params = [{transform_indices = @transform_0, window_bounds = array<i64: 2, 4>}, {transform_indices = @transform_1, window_bounds = array<i64: 1, 4, 191>}, {pipeline_mode = #tpu.pipeline_mode<synchronous>, transform_indices = @transform_2, window_bounds = array<i64: 32, 256>}, {pipeline_mode = #tpu.pipeline_mode<synchronous>, transform_indices = @transform_3, window_bounds = array<i64: 32, 1>}, {pipeline_mode = #tpu.pipeline_mode<synchronous>, transform_indices = @transform_4, window_bounds = array<i64: 4, 8, 1>}, {pipeline_mode = #tpu.pipeline_mode<synchronous>, transform_indices = @transform_5, window_bounds = array<i64: 4, 1>}, {transform_indices = @transform_6, window_bounds = array<i64: 1, 128>}]} {
    %c0 = arith.constant 0 : index
    %c0_0 = arith.constant 0 : index
    %c0_1 = arith.constant 0 : index
    %0 = vector.load %arg3[%c0, %c0_0, %c0_1] : memref<1x4x191xbf16, #tpu.memory_space<vmem>>, vector<1x4x191xbf16>
    %1 = vector.shape_cast %0 : vector<1x4x191xbf16> to vector<4x191xbf16>
    %2 = vector.extract_strided_slice %1 {offsets = [0, 0], sizes = [4, 128], strides = [1, 1]} : vector<4x191xbf16> to vector<4x128xbf16>
    %c0_2 = arith.constant 0 : index
    %c0_3 = arith.constant 0 : index
    %3 = vector.load %arg9[%c0_2, %c0_3] : memref<256x128xbf16, #tpu.memory_space<vmem>>, vector<4x128xbf16>
    tpu.vector_store %arg9[%c0_2, %c0_3], %2 {strides = array<i32>} : memref<256x128xbf16, #tpu.memory_space<vmem>>, vector<4x128xbf16>,
    %4 = vector.extract_strided_slice %1 {offsets = [0, 1], sizes = [4, 128], strides = [1, 1]} : vector<4x191xbf16> to vector<4x128xbf16>
    %c4 = arith.constant 4 : index
    %c0_4 = arith.constant 0 : index
    %5 = vector.load %arg9[%c4, %c0_4] : memref<256x128xbf16, #tpu.memory_space<vmem>>, vector<4x128xbf16>
    tpu.vector_store %arg9[%c4, %c0_4], %4 {strides = array<i32>} : memref<256x128xbf16, #tpu.memory_space<vmem>>, vector<4x128xbf16>,
    %6 = vector.extract_strided_slice %1 {offsets = [0, 2], sizes = [4, 128], strides = [1, 1]} : vector<4x191xbf16> to vector<4x128xbf16>
    %c8 = arith.constant 8 : index
    %c0_5 = arith.constant 0 : index
    %7 = vector.load %arg9[%c8, %c0_5] : memref<256x128xbf16, #tpu.memory_space<vmem>>, vector<4x128xbf16>
    tpu.vector_store %arg9[%c8, %c0_5], %6 {strides = array<i32>} : memref<256x128xbf16, #tpu.memory_space<vmem>>, vector<4x128xbf16>,
    %8 = vector.extract_strided_slice %1 {offsets = [0, 3], sizes = [4, 128], strides = [1, 1]} : vector<4x191xbf16> to vector<4x128xbf16>
    %c12 = arith.constant 12 : index
    %c0_6 = arith.constant 0 : index
    %9 = vector.load %arg9[%c12, %c0_6] : memref<256x128xbf16, #tpu.memory_space<vmem>>, vector<4x128xbf16>
    tpu.vector_store %arg9[%c12, %c0_6], %8 {strides = array<i32>} : memref<256x128xbf16, #tpu.memory_space<vmem>>, vector<4x128xbf16>,
    %10 = vector.extract_strided_slice %1 {offsets = [0, 4], sizes = [4, 128], strides = [1, 1]} : vector<4x191xbf16> to vector<4x128xbf16>
    %c16 = arith.constant 16 : index
    %c0_7 = arith.constant 0 : index
    %11 = vector.load %arg9[%c16, %c0_7] : memref<256x128xbf16, #tpu.memory_space<vmem>>, vector<4x128xbf16>
    tpu.vector_store %arg9[%c16, %c0_7], %10 {strides = array<i32>} : memref<256x128xbf16, #tpu.memory_space<vmem>>, vector<4x128xbf16>,
    %12 = vector.extract_strided_slice %1 {offsets = [0, 5], sizes = [4, 128], strides = [1, 1]} : vector<4x191xbf16> to vector<4x128xbf16>
    %c20 = arith.constant 20 : index
    %c0_8 = arith.constant 0 : index
    %13 = vector.load %arg9[%c20, %c0_8] : memref<256x128xbf16, #tpu.memory_space<vmem>>, vector<4x128xbf16>
    tpu.vector_store %arg9[%c20, %c0_8], %12 {strides = array<i32>} : memref<256x128xbf16, #tpu.memory_space<vmem>>, vector<4x128xbf16>,
    %14 = vector.extract_strided_slice %1 {offsets = [0, 6], sizes = [4, 128], strides = [1, 1]} : vector<4x191xbf16> to vector<4x128xbf16>
    %c24 = arith.constant 24 : index
    %c0_9 = arith.constant 0 : index
    %15 = vector.load %arg9[%c24, %c0_9] : memref<256x128xbf16, #tpu.memory_space<vmem>>, vector<4x128xbf16>
    tpu.vector_store %arg9[%c24, %c0_9], %14 {strides = array<i32>} : memref<256x128xbf16, #tpu.memory_space<vmem>>, vector<4x128xbf16>,
    %16 = vector.extract_strided_slice %1 {offsets = [0, 7], sizes = [4, 128], strides = [1, 1]} : vector<4x191xbf16> to vector<4x128xbf16>
    %c28 = arith.constant 28 : index
    %c0_10 = arith.constant 0 : index
    %17 = vector.load %arg9[%c28, %c0_10] : memref<256x128xbf16, #tpu.memory_space<vmem>>, vector<4x128xbf16>
    tpu.vector_store %arg9[%c28, %c0_10], %16 {strides = array<i32>} : memref<256x128xbf16, #tpu.memory_space<vmem>>, vector<4x128xbf16>,
    %18 = vector.extract_strided_slice %1 {offsets = [0, 8], sizes = [4, 128], strides = [1, 1]} : vector<4x191xbf16> to vector<4x128xbf16>
    %c32 = arith.constant 32 : index
    %c0_11 = arith.constant 0 : index
    %19 = vector.load %arg9[%c32, %c0_11] : memref<256x128xbf16, #tpu.memory_space<vmem>>, vector<4x128xbf16>
    tpu.vector_store %arg9[%c32, %c0_11], %18 {strides = array<i32>} : memref<256x128xbf16, #tpu.memory_space<vmem>>, vector<4x128xbf16>,
    %20 = vector.extract_strided_slice %1 {offsets = [0, 9], sizes = [4, 128], strides = [1, 1]} : vector<4x191xbf16> to vector<4x128xbf16>
    %c36 = arith.constant 36 : index
    %c0_12 = arith.constant 0 : index
    %21 = vector.load %arg9[%c36, %c0_12] : memref<256x128xbf16, #tpu.memory_space<vmem>>, vector<4x128xbf16>
    tpu.vector_store %arg9[%c36, %c0_12], %20 {strides = array<i32>} : memref<256x128xbf16, #tpu.memory_space<vmem>>, vector<4x128xbf16>,
    %22 = vector.extract_strided_slice %1 {offsets = [0, 10], sizes = [4, 128], strides = [1, 1]} : vector<4x191xbf16> to vector<4x128xbf16>
    %c40 = arith.constant 40 : index
    %c0_13 = arith.constant 0 : index
    %23 = vector.load %arg9[%c40, %c0_13] : memref<256x128xbf16, #tpu.memory_space<vmem>>, vector<4x128xbf16>
    tpu.vector_store %arg9[%c40, %c0_13], %22 {strides = array<i32>} : memref<256x128xbf16, #tpu.memory_space<vmem>>, vector<4x128xbf16>,
    %24 = vector.extract_strided_slice %1 {offsets = [0, 11], sizes = [4, 128], strides = [1, 1]} : vector<4x191xbf16> to vector<4x128xbf16>
    %c44 = arith.constant 44 : index
    %c0_14 = arith.constant 0 : index
    %25 = vector.load %arg9[%c44, %c0_14] : memref<256x128xbf16, #tpu.memory_space<vmem>>, vector<4x128xbf16>
    tpu.vector_store %arg9[%c44, %c0_14], %24 {strides = array<i32>} : memref<256x128xbf16, #tpu.memory_space<vmem>>, vector<4x128xbf16>,
    %26 = vector.extract_strided_slice %1 {offsets = [0, 12], sizes = [4, 128], strides = [1, 1]} : vector<4x191xbf16> to vector<4x128xbf16>
    %c48 = arith.constant 48 : index
    %c0_15 = arith.constant 0 : index
    %27 = vector.load %arg9[%c48, %c0_15] : memref<256x128xbf16, #tpu.memory_space<vmem>>, vector<4x128xbf16>
    tpu.vector_store %arg9[%c48, %c0_15], %26 {strides = array<i32>} : memref<256x128xbf16, #tpu.memory_space<vmem>>, vector<4x128xbf16>,
    %28 = vector.extract_strided_slice %1 {offsets = [0, 13], sizes = [4, 128], strides = [1, 1]} : vector<4x191xbf16> to vector<4x128xbf16>
    %c52 = arith.constant 52 : index
    %c0_16 = arith.constant 0 : index
    %29 = vector.load %arg9[%c52, %c0_16] : memref<256x128xbf16, #tpu.memory_space<vmem>>, vector<4x128xbf16>
    tpu.vector_store %arg9[%c52, %c0_16], %28 {strides = array<i32>} : memref<256x128xbf16, #tpu.memory_space<vmem>>, vector<4x128xbf16>,
    %30 = vector.extract_strided_slice %1 {offsets = [0, 14], sizes = [4, 128], strides = [1, 1]} : vector<4x191xbf16> to vector<4x128xbf16>
    %c56 = arith.constant 56 : index
    %c0_17 = arith.constant 0 : index
    %31 = vector.load %arg9[%c56, %c0_17] : memref<256x128xbf16, #tpu.memory_space<vmem>>, vector<4x128xbf16>
    tpu.vector_store %arg9[%c56, %c0_17], %30 {strides = array<i32>} : memref<256x128xbf16, #tpu.memory_space<vmem>>, vector<4x128xbf16>,
    %32 = vector.extract_strided_slice %1 {offsets = [0, 15], sizes = [4, 128], strides = [1, 1]} : vector<4x191xbf16> to vector<4x128xbf16>
    %c60 = arith.constant 60 : index
    %c0_18 = arith.constant 0 : index
    %33 = vector.load %arg9[%c60, %c0_18] : memref<256x128xbf16, #tpu.memory_space<vmem>>, vector<4x128xbf16>
    tpu.vector_store %arg9[%c60, %c0_18], %32 {strides = array<i32>} : memref<256x128xbf16, #tpu.memory_space<vmem>>, vector<4x128xbf16>,
    %34 = vector.extract_strided_slice %1 {offsets = [0, 16], sizes = [4, 128], strides = [1, 1]} : vector<4x191xbf16> to vector<4x128xbf16>
    %c64 = arith.constant 64 : index
    %c0_19 = arith.constant 0 : index
    %35 = vector.load %arg9[%c64, %c0_19] : memref<256x128xbf16, #tpu.memory_space<vmem>>, vector<4x128xbf16>
    tpu.vector_store %arg9[%c64, %c0_19], %34 {strides = array<i32>} : memref<256x128xbf16, #tpu.memory_space<vmem>>, vector<4x128xbf16>,
    %36 = vector.extract_strided_slice %1 {offsets = [0, 17], sizes = [4, 128], strides = [1, 1]} : vector<4x191xbf16> to vector<4x128xbf16>
    %c68 = arith.constant 68 : index
    %c0_20 = arith.constant 0 : index
    %37 = vector.load %arg9[%c68, %c0_20] : memref<256x128xbf16, #tpu.memory_space<vmem>>, vector<4x128xbf16>
    tpu.vector_store %arg9[%c68, %c0_20], %36 {strides = array<i32>} : memref<256x128xbf16, #tpu.memory_space<vmem>>, vector<4x128xbf16>,
    %38 = vector.extract_strided_slice %1 {offsets = [0, 18], sizes = [4, 128], strides = [1, 1]} : vector<4x191xbf16> to vector<4x128xbf16>
    %c72 = arith.constant 72 : index
    %c0_21 = arith.constant 0 : index
    %39 = vector.load %arg9[%c72, %c0_21] : memref<256x128xbf16, #tpu.memory_space<vmem>>, vector<4x128xbf16>
    tpu.vector_store %arg9[%c72, %c0_21], %38 {strides = array<i32>} : memref<256x128xbf16, #tpu.memory_space<vmem>>, vector<4x128xbf16>,
    %40 = vector.extract_strided_slice %1 {offsets = [0, 19], sizes = [4, 128], strides = [1, 1]} : vector<4x191xbf16> to vector<4x128xbf16>
    %c76 = arith.constant 76 : index
    %c0_22 = arith.constant 0 : index
    %41 = vector.load %arg9[%c76, %c0_22] : memref<256x128xbf16, #tpu.memory_space<vmem>>, vector<4x128xbf16>
    tpu.vector_store %arg9[%c76, %c0_22], %40 {strides = array<i32>} : memref<256x128xbf16, #tpu.memory_space<vmem>>, vector<4x128xbf16>,
    %42 = vector.extract_strided_slice %1 {offsets = [0, 20], sizes = [4, 128], strides = [1, 1]} : vector<4x191xbf16> to vector<4x128xbf16>
    %c80 = arith.constant 80 : index
    %c0_23 = arith.constant 0 : index
    %43 = vector.load %arg9[%c80, %c0_23] : memref<256x128xbf16, #tpu.memory_space<vmem>>, vector<4x128xbf16>
    tpu.vector_store %arg9[%c80, %c0_23], %42 {strides = array<i32>} : memref<256x128xbf16, #tpu.memory_space<vmem>>, vector<4x128xbf16>,
    %44 = vector.extract_strided_slice %1 {offsets = [0, 21], sizes = [4, 128], strides = [1, 1]} : vector<4x191xbf16> to vector<4x128xbf16>
    %c84 = arith.constant 84 : index
    %c0_24 = arith.constant 0 : index
    %45 = vector.load %arg9[%c84, %c0_24] : memref<256x128xbf16, #tpu.memory_space<vmem>>, vector<4x128xbf16>
    tpu.vector_store %arg9[%c84, %c0_24], %44 {strides = array<i32>} : memref<256x128xbf16, #tpu.memory_space<vmem>>, vector<4x128xbf16>,
    %46 = vector.extract_strided_slice %1 {offsets = [0, 22], sizes = [4, 128], strides = [1, 1]} : vector<4x191xbf16> to vector<4x128xbf16>
    %c88 = arith.constant 88 : index
    %c0_25 = arith.constant 0 : index
    %47 = vector.load %arg9[%c88, %c0_25] : memref<256x128xbf16, #tpu.memory_space<vmem>>, vector<4x128xbf16>
    tpu.vector_store %arg9[%c88, %c0_25], %46 {strides = array<i32>} : memref<256x128xbf16, #tpu.memory_space<vmem>>, vector<4x128xbf16>,
    %48 = vector.extract_strided_slice %1 {offsets = [0, 23], sizes = [4, 128], strides = [1, 1]} : vector<4x191xbf16> to vector<4x128xbf16>
    %c92 = arith.constant 92 : index
    %c0_26 = arith.constant 0 : index
    %49 = vector.load %arg9[%c92, %c0_26] : memref<256x128xbf16, #tpu.memory_space<vmem>>, vector<4x128xbf16>
    tpu.vector_store %arg9[%c92, %c0_26], %48 {strides = array<i32>} : memref<256x128xbf16, #tpu.memory_space<vmem>>, vector<4x128xbf16>,
    %50 = vector.extract_strided_slice %1 {offsets = [0, 24], sizes = [4, 128], strides = [1, 1]} : vector<4x191xbf16> to vector<4x128xbf16>
    %c96 = arith.constant 96 : index
    %c0_27 = arith.constant 0 : index
    %51 = vector.load %arg9[%c96, %c0_27] : memref<256x128xbf16, #tpu.memory_space<vmem>>, vector<4x128xbf16>
    tpu.vector_store %arg9[%c96, %c0_27], %50 {strides = array<i32>} : memref<256x128xbf16, #tpu.memory_space<vmem>>, vector<4x128xbf16>,
    %52 = vector.extract_strided_slice %1 {offsets = [0, 25], sizes = [4, 128], strides = [1, 1]} : vector<4x191xbf16> to vector<4x128xbf16>
    %c100 = arith.constant 100 : index
    %c0_28 = arith.constant 0 : index
    %53 = vector.load %arg9[%c100, %c0_28] : memref<256x128xbf16, #tpu.memory_space<vmem>>, vector<4x128xbf16>
    tpu.vector_store %arg9[%c100, %c0_28], %52 {strides = array<i32>} : memref<256x128xbf16, #tpu.memory_space<vmem>>, vector<4x128xbf16>,
    %54 = vector.extract_strided_slice %1 {offsets = [0, 26], sizes = [4, 128], strides = [1, 1]} : vector<4x191xbf16> to vector<4x128xbf16>
    %c104 = arith.constant 104 : index
    %c0_29 = arith.constant 0 : index
    %55 = vector.load %arg9[%c104, %c0_29] : memref<256x128xbf16, #tpu.memory_space<vmem>>, vector<4x128xbf16>
    tpu.vector_store %arg9[%c104, %c0_29], %54 {strides = array<i32>} : memref<256x128xbf16, #tpu.memory_space<vmem>>, vector<4x128xbf16>,
    %56 = vector.extract_strided_slice %1 {offsets = [0, 27], sizes = [4, 128], strides = [1, 1]} : vector<4x191xbf16> to vector<4x128xbf16>
    %c108 = arith.constant 108 : index
    %c0_30 = arith.constant 0 : index
    %57 = vector.load %arg9[%c108, %c0_30] : memref<256x128xbf16, #tpu.memory_space<vmem>>, vector<4x128xbf16>
    tpu.vector_store %arg9[%c108, %c0_30], %56 {strides = array<i32>} : memref<256x128xbf16, #tpu.memory_space<vmem>>, vector<4x128xbf16>,
    %58 = vector.extract_strided_slice %1 {offsets = [0, 28], sizes = [4, 128], strides = [1, 1]} : vector<4x191xbf16> to vector<4x128xbf16>
    %c112 = arith.constant 112 : index
    %c0_31 = arith.constant 0 : index
    %59 = vector.load %arg9[%c112, %c0_31] : memref<256x128xbf16, #tpu.memory_space<vmem>>, vector<4x128xbf16>
    tpu.vector_store %arg9[%c112, %c0_31], %58 {strides = array<i32>} : memref<256x128xbf16, #tpu.memory_space<vmem>>, vector<4x128xbf16>,
    %60 = vector.extract_strided_slice %1 {offsets = [0, 29], sizes = [4, 128], strides = [1, 1]} : vector<4x191xbf16> to vector<4x128xbf16>
    %c116 = arith.constant 116 : index
    %c0_32 = arith.constant 0 : index
    %61 = vector.load %arg9[%c116, %c0_32] : memref<256x128xbf16, #tpu.memory_space<vmem>>, vector<4x128xbf16>
    tpu.vector_store %arg9[%c116, %c0_32], %60 {strides = array<i32>} : memref<256x128xbf16, #tpu.memory_space<vmem>>, vector<4x128xbf16>,
    %62 = vector.extract_strided_slice %1 {offsets = [0, 30], sizes = [4, 128], strides = [1, 1]} : vector<4x191xbf16> to vector<4x128xbf16>
    %c120 = arith.constant 120 : index
    %c0_33 = arith.constant 0 : index
    %63 = vector.load %arg9[%c120, %c0_33] : memref<256x128xbf16, #tpu.memory_space<vmem>>, vector<4x128xbf16>
    tpu.vector_store %arg9[%c120, %c0_33], %62 {strides = array<i32>} : memref<256x128xbf16, #tpu.memory_space<vmem>>, vector<4x128xbf16>,
    %64 = vector.extract_strided_slice %1 {offsets = [0, 31], sizes = [4, 128], strides = [1, 1]} : vector<4x191xbf16> to vector<4x128xbf16>
    %c124 = arith.constant 124 : index
    %c0_34 = arith.constant 0 : index
    %65 = vector.load %arg9[%c124, %c0_34] : memref<256x128xbf16, #tpu.memory_space<vmem>>, vector<4x128xbf16>
    tpu.vector_store %arg9[%c124, %c0_34], %64 {strides = array<i32>} : memref<256x128xbf16, #tpu.memory_space<vmem>>, vector<4x128xbf16>,
    %66 = vector.extract_strided_slice %1 {offsets = [0, 32], sizes = [4, 128], strides = [1, 1]} : vector<4x191xbf16> to vector<4x128xbf16>
    %c128 = arith.constant 128 : index
    %c0_35 = arith.constant 0 : index
    %67 = vector.load %arg9[%c128, %c0_35] : memref<256x128xbf16, #tpu.memory_space<vmem>>, vector<4x128xbf16>
    tpu.vector_store %arg9[%c128, %c0_35], %66 {strides = array<i32>} : memref<256x128xbf16, #tpu.memory_space<vmem>>, vector<4x128xbf16>,
    %68 = vector.extract_strided_slice %1 {offsets = [0, 33], sizes = [4, 128], strides = [1, 1]} : vector<4x191xbf16> to vector<4x128xbf16>
    %c132 = arith.constant 132 : index
    %c0_36 = arith.constant 0 : index
    %69 = vector.load %arg9[%c132, %c0_36] : memref<256x128xbf16, #tpu.memory_space<vmem>>, vector<4x128xbf16>
    tpu.vector_store %arg9[%c132, %c0_36], %68 {strides = array<i32>} : memref<256x128xbf16, #tpu.memory_space<vmem>>, vector<4x128xbf16>,
    %70 = vector.extract_strided_slice %1 {offsets = [0, 34], sizes = [4, 128], strides = [1, 1]} : vector<4x191xbf16> to vector<4x128xbf16>
    %c136 = arith.constant 136 : index
    %c0_37 = arith.constant 0 : index
    %71 = vector.load %arg9[%c136, %c0_37] : memref<256x128xbf16, #tpu.memory_space<vmem>>, vector<4x128xbf16>
    tpu.vector_store %arg9[%c136, %c0_37], %70 {strides = array<i32>} : memref<256x128xbf16, #tpu.memory_space<vmem>>, vector<4x128xbf16>,
    %72 = vector.extract_strided_slice %1 {offsets = [0, 35], sizes = [4, 128], strides = [1, 1]} : vector<4x191xbf16> to vector<4x128xbf16>
    %c140 = arith.constant 140 : index
    %c0_38 = arith.constant 0 : index
    %73 = vector.load %arg9[%c140, %c0_38] : memref<256x128xbf16, #tpu.memory_space<vmem>>, vector<4x128xbf16>
    tpu.vector_store %arg9[%c140, %c0_38], %72 {strides = array<i32>} : memref<256x128xbf16, #tpu.memory_space<vmem>>, vector<4x128xbf16>,
    %74 = vector.extract_strided_slice %1 {offsets = [0, 36], sizes = [4, 128], strides = [1, 1]} : vector<4x191xbf16> to vector<4x128xbf16>
    %c144 = arith.constant 144 : index
    %c0_39 = arith.constant 0 : index
    %75 = vector.load %arg9[%c144, %c0_39] : memref<256x128xbf16, #tpu.memory_space<vmem>>, vector<4x128xbf16>
    tpu.vector_store %arg9[%c144, %c0_39], %74 {strides = array<i32>} : memref<256x128xbf16, #tpu.memory_space<vmem>>, vector<4x128xbf16>,
    %76 = vector.extract_strided_slice %1 {offsets = [0, 37], sizes = [4, 128], strides = [1, 1]} : vector<4x191xbf16> to vector<4x128xbf16>
    %c148 = arith.constant 148 : index
    %c0_40 = arith.constant 0 : index
    %77 = vector.load %arg9[%c148, %c0_40] : memref<256x128xbf16, #tpu.memory_space<vmem>>, vector<4x128xbf16>
    tpu.vector_store %arg9[%c148, %c0_40], %76 {strides = array<i32>} : memref<256x128xbf16, #tpu.memory_space<vmem>>, vector<4x128xbf16>,
    %78 = vector.extract_strided_slice %1 {offsets = [0, 38], sizes = [4, 128], strides = [1, 1]} : vector<4x191xbf16> to vector<4x128xbf16>
    %c152 = arith.constant 152 : index
    %c0_41 = arith.constant 0 : index
    %79 = vector.load %arg9[%c152, %c0_41] : memref<256x128xbf16, #tpu.memory_space<vmem>>, vector<4x128xbf16>
    tpu.vector_store %arg9[%c152, %c0_41], %78 {strides = array<i32>} : memref<256x128xbf16, #tpu.memory_space<vmem>>, vector<4x128xbf16>,
    %80 = vector.extract_strided_slice %1 {offsets = [0, 39], sizes = [4, 128], strides = [1, 1]} : vector<4x191xbf16> to vector<4x128xbf16>
    %c156 = arith.constant 156 : index
    %c0_42 = arith.constant 0 : index
    %81 = vector.load %arg9[%c156, %c0_42] : memref<256x128xbf16, #tpu.memory_space<vmem>>, vector<4x128xbf16>
    tpu.vector_store %arg9[%c156, %c0_42], %80 {strides = array<i32>} : memref<256x128xbf16, #tpu.memory_space<vmem>>, vector<4x128xbf16>,
    %82 = vector.extract_strided_slice %1 {offsets = [0, 40], sizes = [4, 128], strides = [1, 1]} : vector<4x191xbf16> to vector<4x128xbf16>
    %c160 = arith.constant 160 : index
    %c0_43 = arith.constant 0 : index
    %83 = vector.load %arg9[%c160, %c0_43] : memref<256x128xbf16, #tpu.memory_space<vmem>>, vector<4x128xbf16>
    tpu.vector_store %arg9[%c160, %c0_43], %82 {strides = array<i32>} : memref<256x128xbf16, #tpu.memory_space<vmem>>, vector<4x128xbf16>,
    %84 = vector.extract_strided_slice %1 {offsets = [0, 41], sizes = [4, 128], strides = [1, 1]} : vector<4x191xbf16> to vector<4x128xbf16>
    %c164 = arith.constant 164 : index
    %c0_44 = arith.constant 0 : index
    %85 = vector.load %arg9[%c164, %c0_44] : memref<256x128xbf16, #tpu.memory_space<vmem>>, vector<4x128xbf16>
    tpu.vector_store %arg9[%c164, %c0_44], %84 {strides = array<i32>} : memref<256x128xbf16, #tpu.memory_space<vmem>>, vector<4x128xbf16>,
    %86 = vector.extract_strided_slice %1 {offsets = [0, 42], sizes = [4, 128], strides = [1, 1]} : vector<4x191xbf16> to vector<4x128xbf16>
    %c168 = arith.constant 168 : index
    %c0_45 = arith.constant 0 : index
    %87 = vector.load %arg9[%c168, %c0_45] : memref<256x128xbf16, #tpu.memory_space<vmem>>, vector<4x128xbf16>
    tpu.vector_store %arg9[%c168, %c0_45], %86 {strides = array<i32>} : memref<256x128xbf16, #tpu.memory_space<vmem>>, vector<4x128xbf16>,
    %88 = vector.extract_strided_slice %1 {offsets = [0, 43], sizes = [4, 128], strides = [1, 1]} : vector<4x191xbf16> to vector<4x128xbf16>
    %c172 = arith.constant 172 : index
    %c0_46 = arith.constant 0 : index
    %89 = vector.load %arg9[%c172, %c0_46] : memref<256x128xbf16, #tpu.memory_space<vmem>>, vector<4x128xbf16>
    tpu.vector_store %arg9[%c172, %c0_46], %88 {strides = array<i32>} : memref<256x128xbf16, #tpu.memory_space<vmem>>, vector<4x128xbf16>,
    %90 = vector.extract_strided_slice %1 {offsets = [0, 44], sizes = [4, 128], strides = [1, 1]} : vector<4x191xbf16> to vector<4x128xbf16>
    %c176 = arith.constant 176 : index
    %c0_47 = arith.constant 0 : index
    %91 = vector.load %arg9[%c176, %c0_47] : memref<256x128xbf16, #tpu.memory_space<vmem>>, vector<4x128xbf16>
    tpu.vector_store %arg9[%c176, %c0_47], %90 {strides = array<i32>} : memref<256x128xbf16, #tpu.memory_space<vmem>>, vector<4x128xbf16>,
    %92 = vector.extract_strided_slice %1 {offsets = [0, 45], sizes = [4, 128], strides = [1, 1]} : vector<4x191xbf16> to vector<4x128xbf16>
    %c180 = arith.constant 180 : index
    %c0_48 = arith.constant 0 : index
    %93 = vector.load %arg9[%c180, %c0_48] : memref<256x128xbf16, #tpu.memory_space<vmem>>, vector<4x128xbf16>
    tpu.vector_store %arg9[%c180, %c0_48], %92 {strides = array<i32>} : memref<256x128xbf16, #tpu.memory_space<vmem>>, vector<4x128xbf16>,
    %94 = vector.extract_strided_slice %1 {offsets = [0, 46], sizes = [4, 128], strides = [1, 1]} : vector<4x191xbf16> to vector<4x128xbf16>
    %c184 = arith.constant 184 : index
    %c0_49 = arith.constant 0 : index
    %95 = vector.load %arg9[%c184, %c0_49] : memref<256x128xbf16, #tpu.memory_space<vmem>>, vector<4x128xbf16>
    tpu.vector_store %arg9[%c184, %c0_49], %94 {strides = array<i32>} : memref<256x128xbf16, #tpu.memory_space<vmem>>, vector<4x128xbf16>,
    %96 = vector.extract_strided_slice %1 {offsets = [0, 47], sizes = [4, 128], strides = [1, 1]} : vector<4x191xbf16> to vector<4x128xbf16>
    %c188 = arith.constant 188 : index
    %c0_50 = arith.constant 0 : index
    %97 = vector.load %arg9[%c188, %c0_50] : memref<256x128xbf16, #tpu.memory_space<vmem>>, vector<4x128xbf16>
    tpu.vector_store %arg9[%c188, %c0_50], %96 {strides = array<i32>} : memref<256x128xbf16, #tpu.memory_space<vmem>>, vector<4x128xbf16>,
    %98 = vector.extract_strided_slice %1 {offsets = [0, 48], sizes = [4, 128], strides = [1, 1]} : vector<4x191xbf16> to vector<4x128xbf16>
    %c192 = arith.constant 192 : index
    %c0_51 = arith.constant 0 : index
    %99 = vector.load %arg9[%c192, %c0_51] : memref<256x128xbf16, #tpu.memory_space<vmem>>, vector<4x128xbf16>
    tpu.vector_store %arg9[%c192, %c0_51], %98 {strides = array<i32>} : memref<256x128xbf16, #tpu.memory_space<vmem>>, vector<4x128xbf16>,
    %100 = vector.extract_strided_slice %1 {offsets = [0, 49], sizes = [4, 128], strides = [1, 1]} : vector<4x191xbf16> to vector<4x128xbf16>
    %c196 = arith.constant 196 : index
    %c0_52 = arith.constant 0 : index
    %101 = vector.load %arg9[%c196, %c0_52] : memref<256x128xbf16, #tpu.memory_space<vmem>>, vector<4x128xbf16>
    tpu.vector_store %arg9[%c196, %c0_52], %100 {strides = array<i32>} : memref<256x128xbf16, #tpu.memory_space<vmem>>, vector<4x128xbf16>,
    %102 = vector.extract_strided_slice %1 {offsets = [0, 50], sizes = [4, 128], strides = [1, 1]} : vector<4x191xbf16> to vector<4x128xbf16>
    %c200 = arith.constant 200 : index
    %c0_53 = arith.constant 0 : index
    %103 = vector.load %arg9[%c200, %c0_53] : memref<256x128xbf16, #tpu.memory_space<vmem>>, vector<4x128xbf16>
    tpu.vector_store %arg9[%c200, %c0_53], %102 {strides = array<i32>} : memref<256x128xbf16, #tpu.memory_space<vmem>>, vector<4x128xbf16>,
    %104 = vector.extract_strided_slice %1 {offsets = [0, 51], sizes = [4, 128], strides = [1, 1]} : vector<4x191xbf16> to vector<4x128xbf16>
    %c204 = arith.constant 204 : index
    %c0_54 = arith.constant 0 : index
    %105 = vector.load %arg9[%c204, %c0_54] : memref<256x128xbf16, #tpu.memory_space<vmem>>, vector<4x128xbf16>
    tpu.vector_store %arg9[%c204, %c0_54], %104 {strides = array<i32>} : memref<256x128xbf16, #tpu.memory_space<vmem>>, vector<4x128xbf16>,
    %106 = vector.extract_strided_slice %1 {offsets = [0, 52], sizes = [4, 128], strides = [1, 1]} : vector<4x191xbf16> to vector<4x128xbf16>
    %c208 = arith.constant 208 : index
    %c0_55 = arith.constant 0 : index
    %107 = vector.load %arg9[%c208, %c0_55] : memref<256x128xbf16, #tpu.memory_space<vmem>>, vector<4x128xbf16>
    tpu.vector_store %arg9[%c208, %c0_55], %106 {strides = array<i32>} : memref<256x128xbf16, #tpu.memory_space<vmem>>, vector<4x128xbf16>,
    %108 = vector.extract_strided_slice %1 {offsets = [0, 53], sizes = [4, 128], strides = [1, 1]} : vector<4x191xbf16> to vector<4x128xbf16>
    %c212 = arith.constant 212 : index
    %c0_56 = arith.constant 0 : index
    %109 = vector.load %arg9[%c212, %c0_56] : memref<256x128xbf16, #tpu.memory_space<vmem>>, vector<4x128xbf16>
    tpu.vector_store %arg9[%c212, %c0_56], %108 {strides = array<i32>} : memref<256x128xbf16, #tpu.memory_space<vmem>>, vector<4x128xbf16>,
    %110 = vector.extract_strided_slice %1 {offsets = [0, 54], sizes = [4, 128], strides = [1, 1]} : vector<4x191xbf16> to vector<4x128xbf16>
    %c216 = arith.constant 216 : index
    %c0_57 = arith.constant 0 : index
    %111 = vector.load %arg9[%c216, %c0_57] : memref<256x128xbf16, #tpu.memory_space<vmem>>, vector<4x128xbf16>
    tpu.vector_store %arg9[%c216, %c0_57], %110 {strides = array<i32>} : memref<256x128xbf16, #tpu.memory_space<vmem>>, vector<4x128xbf16>,
    %112 = vector.extract_strided_slice %1 {offsets = [0, 55], sizes = [4, 128], strides = [1, 1]} : vector<4x191xbf16> to vector<4x128xbf16>
    %c220 = arith.constant 220 : index
    %c0_58 = arith.constant 0 : index
    %113 = vector.load %arg9[%c220, %c0_58] : memref<256x128xbf16, #tpu.memory_space<vmem>>, vector<4x128xbf16>
    tpu.vector_store %arg9[%c220, %c0_58], %112 {strides = array<i32>} : memref<256x128xbf16, #tpu.memory_space<vmem>>, vector<4x128xbf16>,
    %114 = vector.extract_strided_slice %1 {offsets = [0, 56], sizes = [4, 128], strides = [1, 1]} : vector<4x191xbf16> to vector<4x128xbf16>
    %c224 = arith.constant 224 : index
    %c0_59 = arith.constant 0 : index
    %115 = vector.load %arg9[%c224, %c0_59] : memref<256x128xbf16, #tpu.memory_space<vmem>>, vector<4x128xbf16>
    tpu.vector_store %arg9[%c224, %c0_59], %114 {strides = array<i32>} : memref<256x128xbf16, #tpu.memory_space<vmem>>, vector<4x128xbf16>,
    %116 = vector.extract_strided_slice %1 {offsets = [0, 57], sizes = [4, 128], strides = [1, 1]} : vector<4x191xbf16> to vector<4x128xbf16>
    %c228 = arith.constant 228 : index
    %c0_60 = arith.constant 0 : index
    %117 = vector.load %arg9[%c228, %c0_60] : memref<256x128xbf16, #tpu.memory_space<vmem>>, vector<4x128xbf16>
    tpu.vector_store %arg9[%c228, %c0_60], %116 {strides = array<i32>} : memref<256x128xbf16, #tpu.memory_space<vmem>>, vector<4x128xbf16>,
    %118 = vector.extract_strided_slice %1 {offsets = [0, 58], sizes = [4, 128], strides = [1, 1]} : vector<4x191xbf16> to vector<4x128xbf16>
    %c232 = arith.constant 232 : index
    %c0_61 = arith.constant 0 : index
    %119 = vector.load %arg9[%c232, %c0_61] : memref<256x128xbf16, #tpu.memory_space<vmem>>, vector<4x128xbf16>
    tpu.vector_store %arg9[%c232, %c0_61], %118 {strides = array<i32>} : memref<256x128xbf16, #tpu.memory_space<vmem>>, vector<4x128xbf16>,
    %120 = vector.extract_strided_slice %1 {offsets = [0, 59], sizes = [4, 128], strides = [1, 1]} : vector<4x191xbf16> to vector<4x128xbf16>
    %c236 = arith.constant 236 : index
    %c0_62 = arith.constant 0 : index
    %121 = vector.load %arg9[%c236, %c0_62] : memref<256x128xbf16, #tpu.memory_space<vmem>>, vector<4x128xbf16>
    tpu.vector_store %arg9[%c236, %c0_62], %120 {strides = array<i32>} : memref<256x128xbf16, #tpu.memory_space<vmem>>, vector<4x128xbf16>,
    %122 = vector.extract_strided_slice %1 {offsets = [0, 60], sizes = [4, 128], strides = [1, 1]} : vector<4x191xbf16> to vector<4x128xbf16>
    %c240 = arith.constant 240 : index
    %c0_63 = arith.constant 0 : index
    %123 = vector.load %arg9[%c240, %c0_63] : memref<256x128xbf16, #tpu.memory_space<vmem>>, vector<4x128xbf16>
    tpu.vector_store %arg9[%c240, %c0_63], %122 {strides = array<i32>} : memref<256x128xbf16, #tpu.memory_space<vmem>>, vector<4x128xbf16>,
    %124 = vector.extract_strided_slice %1 {offsets = [0, 61], sizes = [4, 128], strides = [1, 1]} : vector<4x191xbf16> to vector<4x128xbf16>
    %c244 = arith.constant 244 : index
    %c0_64 = arith.constant 0 : index
    %125 = vector.load %arg9[%c244, %c0_64] : memref<256x128xbf16, #tpu.memory_space<vmem>>, vector<4x128xbf16>
    tpu.vector_store %arg9[%c244, %c0_64], %124 {strides = array<i32>} : memref<256x128xbf16, #tpu.memory_space<vmem>>, vector<4x128xbf16>,
    %126 = vector.extract_strided_slice %1 {offsets = [0, 62], sizes = [4, 128], strides = [1, 1]} : vector<4x191xbf16> to vector<4x128xbf16>
    %c248 = arith.constant 248 : index
    %c0_65 = arith.constant 0 : index
    %127 = vector.load %arg9[%c248, %c0_65] : memref<256x128xbf16, #tpu.memory_space<vmem>>, vector<4x128xbf16>
    tpu.vector_store %arg9[%c248, %c0_65], %126 {strides = array<i32>} : memref<256x128xbf16, #tpu.memory_space<vmem>>, vector<4x128xbf16>,
    %128 = vector.extract_strided_slice %1 {offsets = [0, 63], sizes = [4, 128], strides = [1, 1]} : vector<4x191xbf16> to vector<4x128xbf16>
    %c252 = arith.constant 252 : index
    %c0_66 = arith.constant 0 : index
    %129 = vector.load %arg9[%c252, %c0_66] : memref<256x128xbf16, #tpu.memory_space<vmem>>, vector<4x128xbf16>
    tpu.vector_store %arg9[%c252, %c0_66], %128 {strides = array<i32>} : memref<256x128xbf16, #tpu.memory_space<vmem>>, vector<4x128xbf16>,
    %c0_67 = arith.constant 0 : index
    %c0_68 = arith.constant 0 : index
    %130 = vector.load %arg4[%c0_67, %c0_68] : memref<32x256xbf16, #tpu.memory_space<vmem>>, vector<32x256xbf16>
    %c0_69 = arith.constant 0 : index
    %c0_70 = arith.constant 0 : index
    %131 = vector.load %arg9[%c0_69, %c0_70] : memref<256x128xbf16, #tpu.memory_space<vmem>>, vector<256x128xbf16>
    %cst = arith.constant dense<0.000000e+00> : vector<32x128xf32>
    %132 = tpu.matmul %130, %131, %cst {dimension_numbers = #tpu.dot_dimension_numbers<[1], [0], [0], [1], [0, 0, 1, 1], [], []>} : vector<32x256xbf16>, vector<256x128xbf16>, vector<32x128xf32> -> vector<32x128xf32>
    %c0_71 = arith.constant 0 : index
    %c0_72 = arith.constant 0 : index
    %133 = vector.load %arg5[%c0_71, %c0_72] : memref<32x1xf32, #tpu.memory_space<vmem>>, vector<32x1xf32>
    %134 = vector.broadcast %133 : vector<32x1xf32> to vector<32x128xf32>
    %135 = arith.addf %132, %134 : vector<32x128xf32>
    %cst_73 = arith.constant 0.000000e+00 : f32
    %136 = vector.broadcast %cst_73 : f32 to vector<32x128xf32>
    %137 = arith.maximumf %135, %136 : vector<32x128xf32>
    %138 = vector.shape_cast %137 : vector<32x128xf32> to vector<4x8x128xf32>
    %c0_74 = arith.constant 0 : index
    %c0_75 = arith.constant 0 : index
    %c0_76 = arith.constant 0 : index
    %139 = vector.load %arg6[%c0_74, %c0_75, %c0_76] : memref<4x8x1xf32, #tpu.memory_space<vmem>>, vector<4x8x1xf32>
    %140 = vector.broadcast %139 : vector<4x8x1xf32> to vector<4x8x128xf32>
    %141 = arith.mulf %138, %140 : vector<4x8x128xf32>
    %cst_77 = arith.constant dense<0.000000e+00> : vector<4x128xf32>
    %142 = vector.multi_reduction <add>, %141, %cst_77 [1] : vector<4x8x128xf32> to vector<4x128xf32>
    %c0_78 = arith.constant 0 : index
    %c0_79 = arith.constant 0 : index
    %143 = vector.load %arg7[%c0_78, %c0_79] : memref<4x1xf32, #tpu.memory_space<vmem>>, vector<4x1xf32>
    %144 = vector.broadcast %143 : vector<4x1xf32> to vector<4x128xf32>
    %145 = arith.addf %142, %144 : vector<4x128xf32>
    %cst_80 = arith.constant 5.000000e-01 : f32
    %146 = vector.broadcast %cst_80 : f32 to vector<4x128xf32>
    %147 = arith.mulf %146, %145 : vector<4x128xf32>
    %148 = math.tanh %147 : vector<4x128xf32>
    %cst_81 = arith.constant 1.000000e+00 : f32
    %149 = vector.broadcast %cst_81 : f32 to vector<4x128xf32>
    %150 = arith.addf %149, %148 : vector<4x128xf32>
    %cst_82 = arith.constant 5.000000e-01 : f32
    %151 = vector.broadcast %cst_82 : f32 to vector<4x128xf32>
    %152 = arith.mulf %151, %150 : vector<4x128xf32>
    %153 = arith.index_cast %arg0 : i32 to index
    %c0_83 = arith.constant 0 : index
    %154 = memref.load %arg2[%153, %c0_83] : memref<2x4xf32, #tpu.memory_space<smem>>
    %155 = vector.extract_strided_slice %152 {offsets = [0, 0], sizes = [1, 128], strides = [1, 1]} : vector<4x128xf32> to vector<1x128xf32>
    %156 = vector.broadcast %154 : f32 to vector<1x128xf32>
    %157 = arith.mulf %156, %155 : vector<1x128xf32>
    %158 = arith.index_cast %arg0 : i32 to index
    %c1 = arith.constant 1 : index
    %159 = memref.load %arg2[%158, %c1] : memref<2x4xf32, #tpu.memory_space<smem>>
    %160 = vector.extract_strided_slice %152 {offsets = [1, 0], sizes = [1, 128], strides = [1, 1]} : vector<4x128xf32> to vector<1x128xf32>
    %161 = vector.broadcast %159 : f32 to vector<1x128xf32>
    %162 = arith.mulf %161, %160 : vector<1x128xf32>
    %163 = arith.addf %157, %162 : vector<1x128xf32>
    %164 = arith.index_cast %arg0 : i32 to index
    %c2 = arith.constant 2 : index
    %165 = memref.load %arg2[%164, %c2] : memref<2x4xf32, #tpu.memory_space<smem>>
    %166 = vector.extract_strided_slice %152 {offsets = [2, 0], sizes = [1, 128], strides = [1, 1]} : vector<4x128xf32> to vector<1x128xf32>
    %167 = vector.broadcast %165 : f32 to vector<1x128xf32>
    %168 = arith.mulf %167, %166 : vector<1x128xf32>
    %169 = arith.addf %163, %168 : vector<1x128xf32>
    %170 = arith.index_cast %arg0 : i32 to index
    %c3 = arith.constant 3 : index
    %171 = memref.load %arg2[%170, %c3] : memref<2x4xf32, #tpu.memory_space<smem>>
    %172 = vector.extract_strided_slice %152 {offsets = [3, 0], sizes = [1, 128], strides = [1, 1]} : vector<4x128xf32> to vector<1x128xf32>
    %173 = vector.broadcast %171 : f32 to vector<1x128xf32>
    %174 = arith.mulf %173, %172 : vector<1x128xf32>
    %175 = arith.addf %169, %174 : vector<1x128xf32>
    %c0_84 = arith.constant 0 : index
    %c0_85 = arith.constant 0 : index
    %176 = vector.load %arg8[%c0_84, %c0_85] : memref<1x128xf32, #tpu.memory_space<vmem>>, vector<1x128xf32>
    tpu.vector_store %arg8[%c0_84, %c0_85], %175 {strides = array<i32>} : memref<1x128xf32, #tpu.memory_space<vmem>>, vector<1x128xf32>,
    return
  }
  func.func @transform_0(%arg0: i32, %arg1: i32) -> (i32, i32) {
    %c0_i32 = arith.constant 0 : i32
    %c0_i32_0 = arith.constant 0 : i32
    %c0_i32_1 = arith.constant 0 : i32
    return %c0_i32, %c0_i32_0 : i32, i32
  }
  func.func @transform_1(%arg0: i32, %arg1: i32) -> (i32, i32, i32) {
    %c1_i32 = arith.constant 1 : i32
    %0 = arith.muli %arg0, %c1_i32 : i32
    %1 = arith.addi %0, %arg1 : i32
    %c0_i32 = arith.constant 0 : i32
    %c0_i32_0 = arith.constant 0 : i32
    %c0_i32_1 = arith.constant 0 : i32
    return %1, %c0_i32, %c0_i32_0 : i32, i32, i32
  }
  func.func @transform_2(%arg0: i32, %arg1: i32) -> (i32, i32) {
    %c0_i32 = arith.constant 0 : i32
    %c0_i32_0 = arith.constant 0 : i32
    %c0_i32_1 = arith.constant 0 : i32
    return %c0_i32, %c0_i32_0 : i32, i32
  }
  func.func @transform_3(%arg0: i32, %arg1: i32) -> (i32, i32) {
    %c0_i32 = arith.constant 0 : i32
    %c0_i32_0 = arith.constant 0 : i32
    %c0_i32_1 = arith.constant 0 : i32
    return %c0_i32, %c0_i32_0 : i32, i32
  }
  func.func @transform_4(%arg0: i32, %arg1: i32) -> (i32, i32, i32) {
    %c0_i32 = arith.constant 0 : i32
    %c0_i32_0 = arith.constant 0 : i32
    %c0_i32_1 = arith.constant 0 : i32
    %c0_i32_2 = arith.constant 0 : i32
    return %c0_i32, %c0_i32_0, %c0_i32_1 : i32, i32, i32
  }
  func.func @transform_5(%arg0: i32, %arg1: i32) -> (i32, i32) {
    %c0_i32 = arith.constant 0 : i32
    %c0_i32_0 = arith.constant 0 : i32
    %c0_i32_1 = arith.constant 0 : i32
    return %c0_i32, %c0_i32_0 : i32, i32
  }
  func.func @transform_6(%arg0: i32, %arg1: i32) -> (i32, i32) {
    %c1_i32 = arith.constant 1 : i32
    %0 = arith.muli %arg0, %c1_i32 : i32
    %1 = arith.addi %0, %arg1 : i32
    %c0_i32 = arith.constant 0 : i32
    %c0_i32_0 = arith.constant 0 : i32
    return %c0_i32, %1 : i32, i32
  }
}

</mosaic_0001>

<bundles_post_ra>
// kernel: sub.1
= control target key start
LH: loop header
LB: loop body
LE: loop exit
PB: predicated region body
PF: predicated region fallthrough
CT: control target
= control target key end

     0   :  { %s34_s0 = inlined_call_operand.vmem [shape: f32[4,1], index: 0, kind: input, shape index: {}]   ;;  %s35_s1 = inlined_call_operand.vmem [shape: f32[4,1], index: 1, kind: input, shape index: {}]   ;;  %s36_s2 = inlined_call_operand.vmem [shape: f32[4,1], index: 2, kind: output, shape index: {}]  }
   0x1   :  { %v3_v0 = vld [vmem:[%s34_s0] sm:$0xf] }
   0x2   :  { %v4_v1 = vld [vmem:[%s35_s1] sm:$0xf] }
   0x3   :  { %v7_v2 = vsub.f32 %v3_v0, %v4_v1 }
   0x5   :  { %9 = vst [vmem:[%s36_s2] sm:$0xf] %v7_v2 }

// kernel: moe_forward.1
= control target key start
LH: loop header
LB: loop body
LE: loop exit
PB: predicated region body
PF: predicated region fallthrough
CT: control target
= control target key end

     0   :  { %11 = vsyncpa [#allocation4], 0  ;;  %s1427_s21 = smov 0   ;;  %s1429_s22 = smov 0   ;;  %s1676_s0 = inlined_call_operand.vmem [shape: f32[2,4], index: 0, kind: input, shape index: {}]   ;;  %s1677_s1 = inlined_call_operand.vmem [shape: bf16[2,4,191], index: 1, kind: input, shape index: {}]   ;;  %s1678_s2 = inlined_call_operand.vmem [shape: bf16[32,256], index: 2, kind: input, shape index: {}]   ;;  %s1679_s3 = inlined_call_operand.vmem [shape: f32[32,1], index: 3, kind: input, shape index: {}]   ;;  %s1680_s4 = inlined_call_operand.vmem [shape: f32[4,8,1], index: 4, kind: input, shape index: {}]   ;;  %s1681_s5 = inlined_call_operand.vmem [shape: f32[4,1], index: 5, kind: input, shape index: {}]   ;;  %s1682_s6 = inlined_call_operand.vmem [shape: f32[1,256], index: 6, kind: output, shape index: {}]  }
   0x1   :  { %s1431_s23 = smov 0  }
   0x2 LB: > { %s1105_s24 = sadd.s32 4294967295, %s1324_s23   ;;  %s29_s25 = sadd.s32 1, %s1320_s22  ;;  %s1324_s23 = sphi %s1431_s23, %s17_s23   ;;  %s1320_s22 = sphi %s1429_s22, %s1686_s22   ;;  %s1316_s21 = sphi %s1427_s21, %s1685_s21  }
   0x3   : > { %p31_p0 = scmp.ge.s32.totalorder %s29_s25, 2  ;;  %p1107_p1 = scmp.ge.s32.totalorder %s1324_s23, 1 }
   0x4   : > { %p195_p2 = scmp.lt.s32.totalorder %s1324_s23, 3  ;;  %p1452_p4 = scmp.eq.s32.totalorder %s1105_s24, 0 }
   0x5   : > { %s1688_s25 = smov (%p31_p0, %s29_s25), 0  ;;  %s208_s30 = sshll.u32 %s1676_s0, 4  ;;  %s209_s30 = int_to_ptr.vmem [resolvable:$true] %s208_s30 }
   0x6   : > { %p1448_p3 = pnand %p1107_p1, %p195_p2  ;;  %s1283_s7 = scalar_lea.vmem %s209_s30, 32 }
   0x7   : > { %p1284_p7 = scmp.ne.s32.totalorder %s209_s30, %s1283_s7  ;;  %p1291_p11 = scmp.lt.s32.totalorder %s209_s30, %s209_s30 }
   0x8   : > { %p1170_p5 = pneg %p1448_p3  ;;  %p1292_p12 = scmp.lt.s32.totalorder %s1283_s7, %s1283_s7 }
   0xa   : > { %p1171_p6 = pnand %p1452_p4, %p1170_p5  ;;  %p1293_p13 = por %p1292_p12, %p1291_p11 }
   0xc   : > { %p1285_p8 = pneg %p1171_p6 }
   0xe   : > { %p1286_p9 = pnand %p1285_p8, %p1284_p7 }
  0x10   : > { %p1287_p10 = pneg %p1286_p9 }
  0x12   : > { %p1294_p0 = pnand %p1293_p13, %p1287_p10 }
  0x14   : > { %1297 = shalt.err (!%p1294_p0)
}
  0x15   : > { %s1326_s8 = smov [#allocation3]   ;;  %243 = sbr.rel (%p1448_p3) target bundleno = 678 (0x2a6), region = 44 }
  0x16   : > { %1173 = dma.vmem_to_smem (!%p1171_p6), %s209_s30, 32, %s1326_s8, [#allocation4]  }
  0x1c   : > { %1311 = dma.done.wait (%p1452_p4), [#allocation4], 32  }
  0x1d   : > { %1313 = vsyncadd (%p1452_p4), [#allocation4], 4294967264 }
  0x1e   : > { %249 = sfence }
  0x1f   : > { %p275_p1 = scmp.lt.s32.totalorder %s1316_s21, 1  ;;  %v294_v0 = vlaneseq  ;;  %v1327_v1 = vmov 1983009808   ;;  %s1328_s14 = smov 94   ;;  %vm561_vm0 = vcmask 785408   ;;  %vm577_vm1 = vcmask 769024  }
  0x20   : > { %v292_v2 = vunpack.c.l.s4 %v1327_v1  ;;  %s1329_s15 = smov 96   ;;  %s1330_s16 = smov 95   ;;  %vm585_vm2 = vcmask 760832   ;;  %vm569_vm3 = vcmask 777216   ;;  %vm310_vm4 = vcmask 1039360  }
  0x21   : > { %s1471_s9 = scalar_select %p275_p1, %s1316_s21, 1  ;;  %v295_v3 = vshrl.u32 %v294_v0, 7  ;;  %vm319_vm5 = vcmask 1031168   ;;  %vm328_vm6 = vcmask 1022976   ;;  %vm593_vm7 = vcmask 752640  }
  0x22   : > { %v293_v4 = vunpack.c.0.s8 %v292_v2  ;;  %s1331_s17 = smov 93   ;;  %s1332_s18 = smov 127   ;;  %vm601_vm8 = vcmask 744448   ;;  %vm609_vm9 = vcmask 736256   ;;  %vm617_vm10 = vcmask 728064  }
  0x23   : > { %s1121_s10 = sshll.u32 %s1471_s9, 2  ;;  %s1333_s19 = smov 126   ;;  %vm337_vm11 = vcmask 1014784   ;;  %vm345_vm12 = vcmask 1006592   ;;  %vm353_vm13 = vcmask 998400   ;;  %vm361_vm14 = vcmask 990208  }
  0x24   : > { %s279_s13 = scalar_lea.vmem %s1677_s1, %s1121_s10  ;;  %v296_v5 = vsub.s32 %v293_v4, %v295_v3  ;;  %s1334_s20 = smov 125   ;;  %vm625_vm15 = vcmask 719872  }
  0x25   : > { %v287_v6 = vld [vmem:[%s279_s13] sm:$0xf]  ;;  %s1335_s24 = smov 92   ;;  %s1336_s26 = smov 91  }
  0x26   : > { %v1477_v7 = vrot.slane %v287_v6, %v296_v5  ;;  %v290_v8 = vcombine.low %v287_v6, %v287_v6  ;;  %288 = vst [vmem:[#allocation2] sm:$0x3] %v287_v6  ;;  %s1337_s27 = smov 90   ;;  %s1338_s28 = smov 89  }
  0x27   : > { %s1339_s29 = smov 124   ;;  %s1340_s30 = smov 123  }
  0x28   : > { %575 = vrot.lane.b32.xlu1 %v1477_v7, %s1328_s14  ;;  %v1480_v9 = vrot.slane %v290_v8, %v296_v5  ;;  %557 = vrot.lane.b32.xlu0 %v1477_v7, %s1329_s15  ;;  %v1485_v10 = vcombine.high %v1477_v7, %v1477_v7  ;;  %v1491_v11 = vcombine.low %v1477_v7, %v1477_v7  ;;  %s1341_s7 = smov 122   ;;  %s1342_s8 = smov 121  }
  0x29   : > { %s1343_s10 = smov 88   ;;  %s1344_s11 = smov 87  }
  0x2a   : > { %v1497_v12 = vcombine.low %v1480_v9, %v1480_v9  ;;  %v1501_v13 = vcombine.high %v1480_v9, %v1480_v9  ;;  %s1345_s12 = smov 86   ;;  %s1346_s13 = smov 85  }
  0x2c   : > { %559 = vrot.lane.b32.xlu0 %v1485_v10, %s1329_s15  ;;  %565 = vrot.lane.b32.xlu1 %v1480_v9, %s1330_s16  ;;  %s1348_s15 = smov 119  }
  0x30   : > { %573 = vrot.lane.b32.xlu0 %v1491_v11, %s1328_s14  ;;  %583 = vrot.lane.b32.xlu1 %v1480_v9, %s1331_s17  ;;  %s1347_s14 = smov 120  }
  0x34   : > { %581 = vrot.lane.b32.xlu0 %v1497_v12, %s1331_s17  ;;  %567 = vrot.lane.b32.xlu1 %v1501_v13, %s1330_s16  ;;  %s1349_s16 = smov 118   ;;  %s1350_s17 = smov 117  }
  0x38   : > { %306 = vrot.lane.b32.xlu0 %v1480_v9, %s1332_s18  ;;  %308 = vrot.lane.b32.xlu1 %v1501_v13, %s1332_s18  ;;  %s1351_s18 = smov 84  }
  0x3c   : > { %315 = vrot.lane.b32.xlu0 %v1491_v11, %s1333_s19  ;;  %317 = vrot.lane.b32.xlu1 %v1477_v7, %s1333_s19  ;;  %s1352_s19 = smov 83  }
  0x40   : > { %324 = vrot.lane.b32.xlu0 %v1497_v12, %s1334_s20  ;;  %326 = vrot.lane.b32.xlu1 %v1480_v9, %s1334_s20  ;;  %s1353_s20 = smov 82  }
  0x44   : > { %589 = vrot.lane.b32.xlu0 %v1477_v7, %s1335_s24  ;;  %591 = vrot.lane.b32.xlu1 %v1485_v10, %s1335_s24  ;;  %s1354_s24 = smov 81  }
  0x48   : > { %597 = vrot.lane.b32.xlu0 %v1480_v9, %s1336_s26  ;;  %599 = vrot.lane.b32.xlu1 %v1501_v13, %s1336_s26  ;;  %s1355_s26 = smov 116  }
  0x4c   : > { %605 = vrot.lane.b32.xlu0 %v1491_v11, %s1337_s27  ;;  %607 = vrot.lane.b32.xlu1 %v1477_v7, %s1337_s27  ;;  %s1356_s27 = smov 115  }
  0x50   : > { %613 = vrot.lane.b32.xlu0 %v1497_v12, %s1338_s28  ;;  %615 = vrot.lane.b32.xlu1 %v1480_v9, %s1338_s28  ;;  %s1357_s28 = smov 114  }
  0x54   : > { %333 = vrot.lane.b32.xlu0 %v1477_v7, %s1339_s29  ;;  %335 = vrot.lane.b32.xlu1 %v1485_v10, %s1339_s29  ;;  %s1358_s29 = smov 113  }
  0x58   : > { %341 = vrot.lane.b32.xlu0 %v1480_v9, %s1340_s30  ;;  %343 = vrot.lane.b32.xlu1 %v1501_v13, %s1340_s30  ;;  %s1359_s30 = smov 80  }
  0x5c   : > { %349 = vrot.lane.b32.xlu0 %v1491_v11, %s1341_s7  ;;  %351 = vrot.lane.b32.xlu1 %v1477_v7, %s1341_s7  ;;  %s1360_s7 = smov 79  }
  0x60   : > { %357 = vrot.lane.b32.xlu0 %v1497_v12, %s1342_s8  ;;  %359 = vrot.lane.b32.xlu1 %v1480_v9, %s1342_s8  ;;  %s1361_s8 = smov 78  }
  0x64   : > { %621 = vrot.lane.b32.xlu0 %v1477_v7, %s1343_s10  ;;  %623 = vrot.lane.b32.xlu1 %v1485_v10, %s1343_s10  ;;  %s1362_s10 = smov 77  }
  0x68   : > { %629 = vrot.lane.b32.xlu0 %v1480_v9, %s1344_s11  ;;  %631 = vrot.lane.b32.xlu1 %v1501_v13, %s1344_s11  ;;  %s1363_s11 = smov 112  }
  0x6c   : > { %637 = vrot.lane.b32.xlu0 %v1491_v11, %s1345_s12  ;;  %639 = vrot.lane.b32.xlu1 %v1477_v7, %s1345_s12  ;;  %s1364_s12 = smov 111  }
  0x70   : > { %645 = vrot.lane.b32.xlu0 %v1497_v12, %s1346_s13  ;;  %647 = vrot.lane.b32.xlu1 %v1480_v9, %s1346_s13  ;;  %s1365_s13 = smov 110  }
  0x74   : > { %365 = vrot.lane.b32.xlu0 %v1477_v7, %s1347_s14  ;;  %367 = vrot.lane.b32.xlu1 %v1485_v10, %s1347_s14  ;;  %s1366_s14 = smov 109  }
  0x78   : > { %373 = vrot.lane.b32.xlu0 %v1480_v9, %s1348_s15  ;;  %375 = vrot.lane.b32.xlu1 %v1501_v13, %s1348_s15  ;;  %s1367_s15 = smov 76  }
  0x7c   : > { %381 = vrot.lane.b32.xlu0 %v1491_v11, %s1349_s16  ;;  %383 = vrot.lane.b32.xlu1 %v1477_v7, %s1349_s16  ;;  %s1368_s16 = smov 75  }
  0x80   : > { %389 = vrot.lane.b32.xlu0 %v1497_v12, %s1350_s17  ;;  %391 = vrot.lane.b32.xlu1 %v1480_v9, %s1350_s17  ;;  %s1369_s17 = smov 74  }
  0x84   : > { %653 = vrot.lane.b32.xlu0 %v1477_v7, %s1351_s18  ;;  %655 = vrot.lane.b32.xlu1 %v1485_v10, %s1351_s18  ;;  %s1370_s18 = smov 73  }
  0x88   : > { %661 = vrot.lane.b32.xlu0 %v1480_v9, %s1352_s19  ;;  %663 = vrot.lane.b32.xlu1 %v1501_v13, %s1352_s19  ;;  %s1371_s19 = smov 108  }
  0x8c   : > { %669 = vrot.lane.b32.xlu0 %v1491_v11, %s1353_s20  ;;  %671 = vrot.lane.b32.xlu1 %v1477_v7, %s1353_s20  ;;  %s1372_s20 = smov 107  }
  0x90   : > { %677 = vrot.lane.b32.xlu0 %v1497_v12, %s1354_s24  ;;  %679 = vrot.lane.b32.xlu1 %v1480_v9, %s1354_s24  ;;  %s1373_s24 = smov 106  }
  0x94   : > { %397 = vrot.lane.b32.xlu0 %v1477_v7, %s1355_s26  ;;  %399 = vrot.lane.b32.xlu1 %v1485_v10, %s1355_s26  ;;  %s1374_s26 = smov 105  }
  0x98   : > { %405 = vrot.lane.b32.xlu0 %v1480_v9, %s1356_s27  ;;  %407 = vrot.lane.b32.xlu1 %v1501_v13, %s1356_s27  ;;  %s1375_s27 = smov 72  }
  0x9a   : > { %v576_v14 = vpop.permute.xlu1 %575  ;;  %v558_v15 = vpop.permute.xlu0 %557 }
  0x9c   : > { %413 = vrot.lane.b32.xlu0 %v1491_v11, %s1357_s28  ;;  %415 = vrot.lane.b32.xlu1 %v1477_v7, %s1357_s28  ;;  %s1376_s28 = smov 71  }
  0x9e   : > { %v560_v16 = vpop.permute.xlu0 %559  ;;  %v566_v17 = vpop.permute.xlu1 %565 }
  0x9f   : > { %v562_v18 = vsel %vm561_vm0, %v558_v15, %v560_v16  ;;  %vm633_vm0 = vcmask 711680  }
  0xa0   : > { %564 = vst [vmem:[#allocation2 + $0x40] sm:$0x3] %v562_v18  ;;  %421 = vrot.lane.b32.xlu0 %v1497_v12, %s1358_s29  ;;  %423 = vrot.lane.b32.xlu1 %v1480_v9, %s1358_s29  ;;  %s1377_s29 = smov 70  }
  0xa2   : > { %v574_v19 = vpop.permute.xlu0 %573  ;;  %v584_v20 = vpop.permute.xlu1 %583 }
  0xa3   : > { %v578_v21 = vsel %vm577_vm1, %v574_v19, %v576_v14  ;;  %vm641_vm1 = vcmask 703488  }
  0xa4   : > { %580 = vst [vmem:[#allocation2 + $0x40] sm:$0x30] %v578_v21  ;;  %685 = vrot.lane.b32.xlu0 %v1477_v7, %s1359_s30  ;;  %687 = vrot.lane.b32.xlu1 %v1485_v10, %s1359_s30  ;;  %s1378_s30 = smov 69  }
  0xa6   : > { %v582_v22 = vpop.permute.xlu0 %581  ;;  %v568_v23 = vpop.permute.xlu1 %567 }
  0xa7   : > { %v586_v24 = vsel %vm585_vm2, %v582_v22, %v584_v20  ;;  %v570_v25 = vsel %vm569_vm3, %v566_v17, %v568_v23  ;;  %vm649_vm2 = vcmask 695296   ;;  %vm369_vm3 = vcmask 982016  }
  0xa8   : > { %588 = vst [vmem:[#allocation2 + $0x40] sm:$0xc0] %v586_v24  ;;  %572 = vst [vmem:[#allocation2 + $0x40] sm:$0xc] %v570_v25  ;;  %693 = vrot.lane.b32.xlu0 %v1480_v9, %s1360_s7  ;;  %695 = vrot.lane.b32.xlu1 %v1501_v13, %s1360_s7  ;;  %s1379_s7 = smov 104  }
  0xaa   : > { %v307_v26 = vpop.permute.xlu0 %306  ;;  %v309_v27 = vpop.permute.xlu1 %308 }
  0xab   : > { %v311_v28 = vsel %vm310_vm4, %v307_v26, %v309_v27  ;;  %vm377_vm4 = vcmask 973824  }
  0xac   : > { %313 = vst [vmem:[#allocation2] sm:$0xc] %v311_v28  ;;  %701 = vrot.lane.b32.xlu0 %v1491_v11, %s1361_s8  ;;  %703 = vrot.lane.b32.xlu1 %v1477_v7, %s1361_s8  ;;  %s1380_s8 = smov 103  }
  0xae   : > { %v316_v29 = vpop.permute.xlu0 %315  ;;  %v318_v30 = vpop.permute.xlu1 %317 }
  0xaf   : > { %v320_v31 = vsel %vm319_vm5, %v316_v29, %v318_v30  ;;  %v825_v32 = vld [vmem:[#allocation2 + $0x40] sm:$0xff]  ;;  %vm385_vm5 = vcmask 965632  }
  0xb0   : > { %322 = vst [vmem:[#allocation2] sm:$0x30] %v320_v31  ;;  %709 = vrot.lane.b32.xlu0 %v1497_v12, %s1362_s10  ;;  %711 = vrot.lane.b32.xlu1 %v1480_v9, %s1362_s10  ;;  %s1381_s10 = smov 102  }
  0xb1   : > { %1122 = vmatprep.subr.bf16.mxu0 %v825_v32  ;;  %1150 = vmatprep.subr.bf16.mxu1 %v825_v32 }
  0xb2   : > { %v325_v33 = vpop.permute.xlu0 %324  ;;  %v327_v34 = vpop.permute.xlu1 %326 }
  0xb3   : > { %v329_v35 = vsel %vm328_vm6, %v325_v33, %v327_v34  ;;  %vm393_vm6 = vcmask 957440  }
  0xb4   : > { %331 = vst [vmem:[#allocation2] sm:$0xc0] %v329_v35  ;;  %429 = vrot.lane.b32.xlu0 %v1477_v7, %s1363_s11  ;;  %431 = vrot.lane.b32.xlu1 %v1485_v10, %s1363_s11  ;;  %s1382_s11 = smov 101  }
  0xb6   : > { %v590_v36 = vpop.permute.xlu0 %589  ;;  %v592_v37 = vpop.permute.xlu1 %591 }
  0xb7   : > { %v594_v38 = vsel %vm593_vm7, %v590_v36, %v592_v37  ;;  %vm657_vm7 = vcmask 687104  }
  0xb8   : > { %596 = vst [vmem:[#allocation2 + $0x48] sm:$0x3] %v594_v38  ;;  %437 = vrot.lane.b32.xlu0 %v1480_v9, %s1364_s12  ;;  %439 = vrot.lane.b32.xlu1 %v1501_v13, %s1364_s12  ;;  %s1383_s12 = smov 68  }
  0xba   : > { %v598_v39 = vpop.permute.xlu0 %597  ;;  %v600_v40 = vpop.permute.xlu1 %599 }
  0xbb   : > { %v602_v41 = vsel %vm601_vm8, %v598_v39, %v600_v40  ;;  %v817_v42 = vld [vmem:[#allocation2] sm:$0xff]  ;;  %vm665_vm8 = vcmask 678912  }
  0xbc   : > { %604 = vst [vmem:[#allocation2 + $0x48] sm:$0xc] %v602_v41  ;;  %445 = vrot.lane.b32.xlu0 %v1491_v11, %s1365_s13  ;;  %447 = vrot.lane.b32.xlu1 %v1477_v7, %s1365_s13  ;;  %s1384_s13 = smov 67  }
  0xbd   : > { %1123 = vmatpush3.bf16.msra.mxu0 %v817_v42  ;;  %1158 = vmatpush3.bf16.msra.mxu1 %v817_v42 }
  0xbe   : > { %v606_v43 = vpop.permute.xlu0 %605  ;;  %v608_v44 = vpop.permute.xlu1 %607 }
  0xbf   : > { %v610_v45 = vsel %vm609_vm9, %v606_v43, %v608_v44  ;;  %vm673_vm9 = vcmask 670720  }
  0xc0   : > { %612 = vst [vmem:[#allocation2 + $0x48] sm:$0x30] %v610_v45  ;;  %453 = vrot.lane.b32.xlu0 %v1497_v12, %s1366_s14  ;;  %455 = vrot.lane.b32.xlu1 %v1480_v9, %s1366_s14  ;;  %s1385_s14 = smov 66  }
  0xc2   : > { %v614_v46 = vpop.permute.xlu0 %613  ;;  %v616_v47 = vpop.permute.xlu1 %615 }
  0xc3   : > { %v618_v48 = vsel %vm617_vm10, %v614_v46, %v616_v47  ;;  %vm681_vm10 = vcmask 662528  }
  0xc4   : > { %620 = vst [vmem:[#allocation2 + $0x48] sm:$0xc0] %v618_v48  ;;  %717 = vrot.lane.b32.xlu0 %v1477_v7, %s1367_s15  ;;  %719 = vrot.lane.b32.xlu1 %v1485_v10, %s1367_s15  ;;  %s1386_s15 = smov 65  }
  0xc6   : > { %v334_v49 = vpop.permute.xlu0 %333  ;;  %v336_v50 = vpop.permute.xlu1 %335 }
  0xc7   : > { %v338_v51 = vsel %vm337_vm11, %v334_v49, %v336_v50  ;;  %vm401_vm11 = vcmask 949248  }
  0xc8   : > { %340 = vst [vmem:[#allocation2 + $0x8] sm:$0x3] %v338_v51  ;;  %725 = vrot.lane.b32.xlu0 %v1480_v9, %s1368_s16  ;;  %727 = vrot.lane.b32.xlu1 %v1501_v13, %s1368_s16  ;;  %s1387_s16 = smov 100  }
  0xca   : > { %v342_v52 = vpop.permute.xlu0 %341  ;;  %v344_v53 = vpop.permute.xlu1 %343 }
  0xcb   : > { %v346_v54 = vsel %vm345_vm12, %v342_v52, %v344_v53  ;;  %v826_v55 = vld [vmem:[#allocation2 + $0x48] sm:$0xff]  ;;  %vm409_vm12 = vcmask 941056  }
  0xcc   : > { %348 = vst [vmem:[#allocation2 + $0x8] sm:$0xc] %v346_v54  ;;  %733 = vrot.lane.b32.xlu0 %v1491_v11, %s1369_s17  ;;  %735 = vrot.lane.b32.xlu1 %v1477_v7, %s1369_s17  ;;  %s1388_s17 = smov 99  }
  0xcd   : > { %1124 = vmatprep.subr.bf16.mxu0 %v826_v55  ;;  %1151 = vmatprep.subr.bf16.mxu1 %v826_v55 }
  0xce   : > { %v350_v56 = vpop.permute.xlu0 %349  ;;  %v352_v57 = vpop.permute.xlu1 %351 }
  0xcf   : > { %v354_v58 = vsel %vm353_vm13, %v350_v56, %v352_v57  ;;  %vm417_vm13 = vcmask 932864  }
  0xd0   : > { %356 = vst [vmem:[#allocation2 + $0x8] sm:$0x30] %v354_v58  ;;  %741 = vrot.lane.b32.xlu0 %v1497_v12, %s1370_s18  ;;  %743 = vrot.lane.b32.xlu1 %v1480_v9, %s1370_s18  ;;  %s1389_s18 = smov 98  }
  0xd2   : > { %v358_v59 = vpop.permute.xlu0 %357  ;;  %v360_v60 = vpop.permute.xlu1 %359 }
  0xd3   : > { %v362_v61 = vsel %vm361_vm14, %v358_v59, %v360_v60  ;;  %vm425_vm14 = vcmask 924672  }
  0xd4   : > { %364 = vst [vmem:[#allocation2 + $0x8] sm:$0xc0] %v362_v61  ;;  %461 = vrot.lane.b32.xlu0 %v1477_v7, %s1371_s19  ;;  %463 = vrot.lane.b32.xlu1 %v1485_v10, %s1371_s19 }
  0xd6   : > { %v622_v62 = vpop.permute.xlu0 %621  ;;  %v624_v63 = vpop.permute.xlu1 %623 }
  0xd7   : > { %v626_v0 = vsel %vm625_vm15, %v622_v62, %v624_v63  ;;  %vm689_vm15 = vcmask 654336  }
  0xd8   : > { %628 = vst [vmem:[#allocation2 + $0x50] sm:$0x3] %v626_v0  ;;  %469 = vrot.lane.b32.xlu0 %v1480_v9, %s1372_s20  ;;  %471 = vrot.lane.b32.xlu1 %v1501_v13, %s1372_s20 }
  0xda   : > { %v630_v1 = vpop.permute.xlu0 %629  ;;  %v632_v2 = vpop.permute.xlu1 %631 }
  0xdb   : > { %v634_v3 = vsel %vm633_vm0, %v630_v1, %v632_v2  ;;  %v818_v4 = vld [vmem:[#allocation2 + $0x8] sm:$0xff]  ;;  %vm697_vm0 = vcmask 646144   ;;  %v833_v2 = vld [vmem:[%s1679_s3] sm:$0xff] }
  0xdc   : > { %636 = vst [vmem:[#allocation2 + $0x50] sm:$0xc] %v634_v3  ;;  %477 = vrot.lane.b32.xlu0 %v1491_v11, %s1373_s24  ;;  %479 = vrot.lane.b32.xlu1 %v1477_v7, %s1373_s24 }
  0xdd   : > { %1125 = vmatpush3.bf16.msra.mxu0 %v818_v4  ;;  %1159 = vmatpush3.bf16.msra.mxu1 %v818_v4 }
  0xde   : > { %v638_v5 = vpop.permute.xlu0 %637  ;;  %v640_v6 = vpop.permute.xlu1 %639 }
  0xdf   : > { %v642_v8 = vsel %vm641_vm1, %v638_v5, %v640_v6  ;;  %vm705_vm1 = vcmask 637952  }
  0xe0   : > { %644 = vst [vmem:[#allocation2 + $0x50] sm:$0x30] %v642_v8  ;;  %485 = vrot.lane.b32.xlu0 %v1497_v12, %s1374_s26  ;;  %487 = vrot.lane.b32.xlu1 %v1480_v9, %s1374_s26 }
  0xe2   : > { %v646_v14 = vpop.permute.xlu0 %645  ;;  %v648_v15 = vpop.permute.xlu1 %647 }
  0xe3   : > { %v650_v16 = vsel %vm649_vm2, %v646_v14, %v648_v15  ;;  %vm713_vm2 = vcmask 629760  }
  0xe4   : > { %652 = vst [vmem:[#allocation2 + $0x50] sm:$0xc0] %v650_v16  ;;  %749 = vrot.lane.b32.xlu0 %v1477_v7, %s1375_s27  ;;  %751 = vrot.lane.b32.xlu1 %v1485_v10, %s1375_s27  ;;  %s1390_s27 = smov 97  }
  0xe6   : > { %v366_v17 = vpop.permute.xlu0 %365  ;;  %v368_v18 = vpop.permute.xlu1 %367 }
  0xe7   : > { %v370_v19 = vsel %vm369_vm3, %v366_v17, %v368_v18  ;;  %vm433_vm3 = vcmask 916480   ;;  %v930_v17 = vld [vmem:[%s1680_s4] sm:$0xff]  ;;  %v931_v18 = vld [vmem:[%s1680_s4 + $0x8] sm:$0xff] }
  0xe8   : > { %372 = vst [vmem:[#allocation2 + $0x10] sm:$0x3] %v370_v19  ;;  %757 = vrot.lane.b32.xlu0 %v1480_v9, %s1376_s28  ;;  %759 = vrot.lane.b32.xlu1 %v1501_v13, %s1376_s28 }
  0xea   : > { %v374_v20 = vpop.permute.xlu0 %373  ;;  %v376_v21 = vpop.permute.xlu1 %375 }
  0xeb   : > { %v378_v22 = vsel %vm377_vm4, %v374_v20, %v376_v21  ;;  %v827_v23 = vld [vmem:[#allocation2 + $0x50] sm:$0xff]  ;;  %vm441_vm4 = vcmask 908288  }
  0xec   : > { %380 = vst [vmem:[#allocation2 + $0x10] sm:$0xc] %v378_v22  ;;  %765 = vrot.lane.b32.xlu0 %v1491_v11, %s1377_s29  ;;  %767 = vrot.lane.b32.xlu1 %v1477_v7, %s1377_s29 }
  0xed   : > { %1126 = vmatprep.subr.bf16.mxu0 %v827_v23  ;;  %1152 = vmatprep.subr.bf16.mxu1 %v827_v23  ;;  %v932_v23 = vld [vmem:[%s1680_s4 + $0x10] sm:$0xff] }
  0xee   : > { %v382_v24 = vpop.permute.xlu0 %381  ;;  %v384_v25 = vpop.permute.xlu1 %383 }
  0xef   : > { %v386_v26 = vsel %vm385_vm5, %v382_v24, %v384_v25  ;;  %vm449_vm5 = vcmask 900096   ;;  %v933_v24 = vld [vmem:[%s1680_s4 + $0x18] sm:$0xff] }
  0xf0   : > { %388 = vst [vmem:[#allocation2 + $0x10] sm:$0x30] %v386_v26  ;;  %773 = vrot.lane.b32.xlu0 %v1497_v12, %s1378_s30  ;;  %775 = vrot.lane.b32.xlu1 %v1480_v9, %s1378_s30 }
  0xf2   : > { %v390_v27 = vpop.permute.xlu0 %389  ;;  %v392_v28 = vpop.permute.xlu1 %391 }
  0xf3   : > { %v394_v29 = vsel %vm393_vm6, %v390_v27, %v392_v28  ;;  %vm457_vm6 = vcmask 891904   ;;  %v982_v28 = vld [vmem:[%s1681_s5] sm:$0xf] }
  0xf4   : > { %396 = vst [vmem:[#allocation2 + $0x10] sm:$0xc0] %v394_v29  ;;  %493 = vrot.lane.b32.xlu0 %v1477_v7, %s1379_s7  ;;  %495 = vrot.lane.b32.xlu1 %v1485_v10, %s1379_s7  ;;  %s1118_s7 = sshll.u32 %s1316_s21, 7 }
  0xf6   : > { %v654_v30 = vpop.permute.xlu0 %653  ;;  %v656_v31 = vpop.permute.xlu1 %655 }
  0xf7   : > { %v658_v32 = vsel %vm657_vm7, %v654_v30, %v656_v31  ;;  %vm721_vm7 = vcmask 621568  }
  0xf8   : > { %660 = vst [vmem:[#allocation2 + $0x58] sm:$0x3] %v658_v32  ;;  %501 = vrot.lane.b32.xlu0 %v1480_v9, %s1380_s8  ;;  %503 = vrot.lane.b32.xlu1 %v1501_v13, %s1380_s8  ;;  %s1018_s8 = sadd.s32 1, %s1118_s7 }
  0xfa   : > { %v662_v33 = vpop.permute.xlu0 %661  ;;  %v664_v34 = vpop.permute.xlu1 %663 }
  0xfb   : > { %v666_v35 = vsel %vm665_vm8, %v662_v33, %v664_v34  ;;  %v819_v36 = vld [vmem:[#allocation2 + $0x10] sm:$0xff]  ;;  %vm729_vm8 = vcmask 613376  }
  0xfc   : > { %668 = vst [vmem:[#allocation2 + $0x58] sm:$0xc] %v666_v35  ;;  %509 = vrot.lane.b32.xlu0 %v1491_v11, %s1381_s10  ;;  %511 = vrot.lane.b32.xlu1 %v1477_v7, %s1381_s10  ;;  %s1023_s10 = sadd.s32 2, %s1118_s7 }
  0xfd   : > { %1127 = vmatpush3.bf16.msra.mxu0 %v819_v36  ;;  %1160 = vmatpush3.bf16.msra.mxu1 %v819_v36 }
  0xfe   : > { %v670_v37 = vpop.permute.xlu0 %669  ;;  %v672_v38 = vpop.permute.xlu1 %671 }
  0xff   : > { %v674_v39 = vsel %vm673_vm9, %v670_v37, %v672_v38  ;;  %vm737_vm9 = vcmask 605184  }
 0x100   : > { %676 = vst [vmem:[#allocation2 + $0x58] sm:$0x30] %v674_v39  ;;  %517 = vrot.lane.b32.xlu0 %v1497_v12, %s1382_s11  ;;  %519 = vrot.lane.b32.xlu1 %v1480_v9, %s1382_s11  ;;  %s1015_s11 = sld [smem:[#allocation3 + %s1118_s7]] }
 0x102   : > { %v678_v40 = vpop.permute.xlu0 %677  ;;  %v680_v41 = vpop.permute.xlu1 %679 }
 0x103   : > { %v682_v42 = vsel %vm681_vm10, %v678_v40, %v680_v41  ;;  %vm745_vm10 = vcmask 596992  }
 0x104   : > { %684 = vst [vmem:[#allocation2 + $0x58] sm:$0xc0] %v682_v42  ;;  %781 = vrot.lane.b32.xlu0 %v1477_v7, %s1383_s12  ;;  %783 = vrot.lane.b32.xlu1 %v1485_v10, %s1383_s12  ;;  %s1019_s12 = sld [smem:[#allocation3 + %s1018_s8]] }
 0x106   : > { %v398_v43 = vpop.permute.xlu0 %397  ;;  %v400_v44 = vpop.permute.xlu1 %399 }
 0x107   : > { %v402_v45 = vsel %vm401_vm11, %v398_v43, %v400_v44  ;;  %vm465_vm11 = vcmask 883712  }
 0x108   : > { %404 = vst [vmem:[#allocation2 + $0x18] sm:$0x3] %v402_v45  ;;  %789 = vrot.lane.b32.xlu0 %v1480_v9, %s1384_s13  ;;  %791 = vrot.lane.b32.xlu1 %v1501_v13, %s1384_s13  ;;  %s1028_s13 = sadd.s32 3, %s1118_s7 }
 0x10a   : > { %v406_v46 = vpop.permute.xlu0 %405  ;;  %v408_v47 = vpop.permute.xlu1 %407 }
 0x10b   : > { %v410_v48 = vsel %vm409_vm12, %v406_v46, %v408_v47  ;;  %v828_v49 = vld [vmem:[#allocation2 + $0x58] sm:$0xff]  ;;  %vm473_vm12 = vcmask 875520  }
 0x10c   : > { %412 = vst [vmem:[#allocation2 + $0x18] sm:$0xc] %v410_v48  ;;  %797 = vrot.lane.b32.xlu0 %v1491_v11, %s1385_s14  ;;  %799 = vrot.lane.b32.xlu1 %v1477_v7, %s1385_s14  ;;  %s1024_s14 = sld [smem:[#allocation3 + %s1023_s10]] }
 0x10d   : > { %1128 = vmatprep.subr.bf16.mxu0 %v828_v49  ;;  %1153 = vmatprep.subr.bf16.mxu1 %v828_v49 }
 0x10e   : > { %v414_v50 = vpop.permute.xlu0 %413  ;;  %v416_v51 = vpop.permute.xlu1 %415 }
 0x10f   : > { %v418_v52 = vsel %vm417_vm13, %v414_v50, %v416_v51  ;;  %vm481_vm13 = vcmask 867328  }
 0x110   : > { %420 = vst [vmem:[#allocation2 + $0x18] sm:$0x30] %v418_v52  ;;  %805 = vrot.lane.b32.xlu0 %v1497_v12, %s1386_s15  ;;  %807 = vrot.lane.b32.xlu1 %v1480_v9, %s1386_s15  ;;  %s1029_s15 = sld [smem:[#allocation3 + %s1028_s13]] }
 0x112   : > { %v422_v53 = vpop.permute.xlu0 %421  ;;  %v424_v54 = vpop.permute.xlu1 %423 }
 0x113   : > { %v426_v55 = vsel %vm425_vm14, %v422_v53, %v424_v54  ;;  %vm489_vm14 = vcmask 859136  }
 0x114   : > { %428 = vst [vmem:[#allocation2 + $0x18] sm:$0xc0] %v426_v55  ;;  %525 = vrot.lane.b32.xlu0 %v1477_v7, %s1387_s16  ;;  %527 = vrot.lane.b32.xlu1 %v1485_v10, %s1387_s16  ;;  %v1271_v10 = vld [vmem:[%s1678_s2 + $0x4] ss:$8 sps:$4 sm:$0xff]  }
 0x115   : > { %909 = vmatprep.mubr.bf16.mxu0 %v1271_v10 }
 0x116   : > { %v686_v56 = vpop.permute.xlu0 %685  ;;  %v688_v57 = vpop.permute.xlu1 %687 }
 0x117   : > { %v690_v58 = vsel %vm689_vm15, %v686_v56, %v688_v57  ;;  %vm753_vm15 = vcmask 588800  }
 0x118   : > { %692 = vst [vmem:[#allocation2 + $0x60] sm:$0x3] %v690_v58  ;;  %533 = vrot.lane.b32.xlu0 %v1480_v9, %s1388_s17  ;;  %535 = vrot.lane.b32.xlu1 %v1501_v13, %s1388_s17  ;;  %v1274_v13 = vld [vmem:[%s1678_s2 + $0x14] ss:$8 sps:$4 sm:$0xff]   ;;  %s284_s17 = scalar_lea.vmem %s1682_s6, %s1471_s9 }
 0x119   : > { %917 = vmatprep.mubr.bf16.mxu1 %v1274_v13 }
 0x11a   : > { %v694_v59 = vpop.permute.xlu0 %693  ;;  %v696_v60 = vpop.permute.xlu1 %695 }
 0x11b   : > { %v698_v61 = vsel %vm697_vm0, %v694_v59, %v696_v60  ;;  %v820_v62 = vld [vmem:[#allocation2 + $0x18] sm:$0xff]  ;;  %vm761_vm0 = vcmask 580608  }
 0x11c   : > { %700 = vst [vmem:[#allocation2 + $0x60] sm:$0xc] %v698_v61  ;;  %541 = vrot.lane.b32.xlu0 %v1491_v11, %s1389_s18  ;;  %543 = vrot.lane.b32.xlu1 %v1477_v7, %s1389_s18  ;;  %v1391_v7 = vmov 0   ;;  %v834_v11 = vld [vmem:[%s1679_s3 + $0x8] sm:$0xff] }
 0x11d   : > { %1129 = vmatpush3.bf16.msra.mxu0 %v820_v62  ;;  %1161 = vmatpush3.bf16.msra.mxu1 %v820_v62 }
 0x11e   : > { %v702_v63 = vpop.permute.xlu0 %701  ;;  %v704_v0 = vpop.permute.xlu1 %703  ;;  %1267 = vset.pattern.permute.xlu1 %v1391_v7  ;;  %1266 = vset.pattern.permute.xlu0 %v1391_v7 }
 0x11f   : > { %v706_v1 = vsel %vm705_vm1, %v702_v63, %v704_v0  ;;  %vm769_vm1 = vcmask 572416  }
 0x120   : > { %708 = vst [vmem:[#allocation2 + $0x60] sm:$0x30] %v706_v1  ;;  %549 = vrot.lane.b32.xlu0 %v1497_v12, %s1390_s27  ;;  %551 = vrot.lane.b32.xlu1 %v1480_v9, %s1390_s27  ;;  %v835_v9 = vld [vmem:[%s1679_s3 + $0x10] sm:$0xff]  ;;  %v836_v12 = vld [vmem:[%s1679_s3 + $0x18] sm:$0xff] }
 0x122   : > { %v710_v3 = vpop.permute.xlu0 %709  ;;  %v712_v4 = vpop.permute.xlu1 %711 }
 0x123   : > { %v714_v5 = vsel %vm713_vm2, %v710_v3, %v712_v4  ;;  %vm777_vm2 = vcmask 564224  }
 0x124   : > { %716 = vst [vmem:[#allocation2 + $0x60] sm:$0xc0] %v714_v5  ;;  %844 = vperm.xlu1 %1267, %v834_v11   ;;  %839 = vperm.xlu0 %1266, %v833_v2  }
 0x126   : > { %v430_v6 = vpop.permute.xlu0 %429  ;;  %v432_v8 = vpop.permute.xlu1 %431 }
 0x127   : > { %v434_v14 = vsel %vm433_vm3, %v430_v6, %v432_v8  ;;  %vm497_vm3 = vcmask 850944  }
 0x128   : > { %436 = vst [vmem:[#allocation2 + $0x20] sm:$0x3] %v434_v14  ;;  %849 = vperm.xlu1 %1267, %v835_v9   ;;  %854 = vperm.xlu0 %1266, %v836_v12  }
 0x12a   : > { %v438_v15 = vpop.permute.xlu0 %437  ;;  %v440_v16 = vpop.permute.xlu1 %439 }
 0x12b   : > { %v442_v19 = vsel %vm441_vm4, %v438_v15, %v440_v16  ;;  %v829_v20 = vld [vmem:[#allocation2 + $0x60] sm:$0xff]  ;;  %vm505_vm4 = vcmask 842752  }
 0x12c   : > { %444 = vst [vmem:[#allocation2 + $0x20] sm:$0xc] %v442_v19  ;;  %1130 = vmatprep.subr.bf16.mxu0 %v829_v20  ;;  %1154 = vmatprep.subr.bf16.mxu1 %v829_v20 }
 0x12d   : > { %936 = vperm.xlu1 %1267, %v930_v17   ;;  %941 = vperm.xlu0 %1266, %v931_v18  }
 0x12e   : > { %v446_v21 = vpop.permute.xlu0 %445  ;;  %v448_v22 = vpop.permute.xlu1 %447 }
 0x12f   : > { %v450_v25 = vsel %vm449_vm5, %v446_v21, %v448_v22  ;;  %vm513_vm5 = vcmask 834560  }
 0x130   : > { %452 = vst [vmem:[#allocation2 + $0x20] sm:$0x30] %v450_v25 }
 0x131   : > { %946 = vperm.xlu1 %1267, %v932_v23   ;;  %951 = vperm.xlu0 %1266, %v933_v24  }
 0x132   : > { %v454_v26 = vpop.permute.xlu0 %453  ;;  %v456_v27 = vpop.permute.xlu1 %455 }
 0x133   : > { %v458_v29 = vsel %vm457_vm6, %v454_v26, %v456_v27  ;;  %vm521_vm6 = vcmask 826368  }
 0x134   : > { %460 = vst [vmem:[#allocation2 + $0x20] sm:$0xc0] %v458_v29 }
 0x135   : > { %985 = vperm.xlu1 %1267, %v982_v28  }
 0x136   : > { %v718_v30 = vpop.permute.xlu0 %717  ;;  %v720_v31 = vpop.permute.xlu1 %719 }
 0x137   : > { %v722_v32 = vsel %vm721_vm7, %v718_v30, %v720_v31  ;;  %vm785_vm7 = vcmask 556032  }
 0x138   : > { %724 = vst [vmem:[#allocation2 + $0x68] sm:$0x3] %v722_v32 }
 0x13a   : > { %v726_v33 = vpop.permute.xlu0 %725  ;;  %v728_v34 = vpop.permute.xlu1 %727 }
 0x13b   : > { %v730_v35 = vsel %vm729_vm8, %v726_v33, %v728_v34  ;;  %v821_v36 = vld [vmem:[#allocation2 + $0x20] sm:$0xff]  ;;  %vm793_vm8 = vcmask 547840  }
 0x13c   : > { %732 = vst [vmem:[#allocation2 + $0x68] sm:$0xc] %v730_v35  ;;  %1131 = vmatpush3.bf16.msra.mxu0 %v821_v36  ;;  %1162 = vmatpush3.bf16.msra.mxu1 %v821_v36 }
 0x13e   : > { %v734_v37 = vpop.permute.xlu0 %733  ;;  %v736_v38 = vpop.permute.xlu1 %735 }
 0x13f   : > { %v738_v39 = vsel %vm737_vm9, %v734_v37, %v736_v38  ;;  %vm801_vm9 = vcmask 539648  }
 0x140   : > { %740 = vst [vmem:[#allocation2 + $0x68] sm:$0x30] %v738_v39 }
 0x142   : > { %v742_v40 = vpop.permute.xlu0 %741  ;;  %v744_v41 = vpop.permute.xlu1 %743 }
 0x143   : > { %v746_v42 = vsel %vm745_vm10, %v742_v40, %v744_v41  ;;  %vm809_vm10 = vcmask 531456  }
 0x144   : > { %748 = vst [vmem:[#allocation2 + $0x68] sm:$0xc0] %v746_v42 }
 0x146   : > { %v462_v43 = vpop.permute.xlu0 %461  ;;  %v464_v44 = vpop.permute.xlu1 %463 }
 0x147   : > { %v466_v45 = vsel %vm465_vm11, %v462_v43, %v464_v44  ;;  %vm529_vm11 = vcmask 818176  }
 0x148   : > { %468 = vst [vmem:[#allocation2 + $0x28] sm:$0x3] %v466_v45  ;;  %v1269_v45 = vld [vmem:[%s1678_s2] ss:$8 sps:$4 sm:$0xff]  }
 0x14a   : > { %v470_v46 = vpop.permute.xlu0 %469  ;;  %v472_v47 = vpop.permute.xlu1 %471 }
 0x14b   : > { %v474_v48 = vsel %vm473_vm12, %v470_v46, %v472_v47  ;;  %v830_v49 = vld [vmem:[#allocation2 + $0x68] sm:$0xff]  ;;  %vm537_vm12 = vcmask 809984   ;;  %v1272_v46 = vld [vmem:[%s1678_s2 + $0x10] ss:$8 sps:$4 sm:$0xff]  }
 0x14c   : > { %476 = vst [vmem:[#allocation2 + $0x28] sm:$0xc] %v474_v48  ;;  %1132 = vmatprep.subr.bf16.mxu0 %v830_v49  ;;  %1155 = vmatprep.subr.bf16.mxu1 %v830_v49 }
 0x14e   : > { %v478_v50 = vpop.permute.xlu0 %477  ;;  %v480_v51 = vpop.permute.xlu1 %479 }
 0x14f   : > { %v482_v52 = vsel %vm481_vm13, %v478_v50, %v480_v51  ;;  %vm545_vm13 = vcmask 801792  }
 0x150   : > { %484 = vst [vmem:[#allocation2 + $0x28] sm:$0x30] %v482_v52 }
 0x152   : > { %v486_v53 = vpop.permute.xlu0 %485  ;;  %v488_v54 = vpop.permute.xlu1 %487 }
 0x153   : > { %v490_v55 = vsel %vm489_vm14, %v486_v53, %v488_v54  ;;  %vm553_vm14 = vcmask 793600  }
 0x154   : > { %492 = vst [vmem:[#allocation2 + $0x28] sm:$0xc0] %v490_v55 }
 0x156   : > { %v750_v56 = vpop.permute.xlu0 %749  ;;  %v752_v57 = vpop.permute.xlu1 %751 }
 0x157   : > { %v754_v58 = vsel %vm753_vm15, %v750_v56, %v752_v57 }
 0x158   : > { %756 = vst [vmem:[#allocation2 + $0x70] sm:$0x3] %v754_v58 }
 0x15a   : > { %v758_v59 = vpop.permute.xlu0 %757  ;;  %v760_v60 = vpop.permute.xlu1 %759 }
 0x15b   : > { %v762_v61 = vsel %vm761_vm0, %v758_v59, %v760_v60  ;;  %v822_v62 = vld [vmem:[#allocation2 + $0x28] sm:$0xff] }
 0x15c   : > { %764 = vst [vmem:[#allocation2 + $0x70] sm:$0xc] %v762_v61  ;;  %1133 = vmatpush3.bf16.msra.mxu0 %v822_v62  ;;  %1163 = vmatpush3.bf16.msra.mxu1 %v822_v62 }
 0x15e   : > { %v766_v10 = vpop.permute.xlu0 %765  ;;  %v768_v13 = vpop.permute.xlu1 %767 }
 0x15f   : > { %v770_v63 = vsel %vm769_vm1, %v766_v10, %v768_v13 }
 0x160   : > { %772 = vst [vmem:[#allocation2 + $0x70] sm:$0x30] %v770_v63 }
 0x162   : > { %v774_v0 = vpop.permute.xlu0 %773  ;;  %v776_v1 = vpop.permute.xlu1 %775 }
 0x163   : > { %v778_v7 = vsel %vm777_vm2, %v774_v0, %v776_v1 }
 0x164   : > { %780 = vst [vmem:[#allocation2 + $0x70] sm:$0xc0] %v778_v7 }
 0x166   : > { %v494_v11 = vpop.permute.xlu0 %493  ;;  %v496_v2 = vpop.permute.xlu1 %495 }
 0x167   : > { %v498_v3 = vsel %vm497_vm3, %v494_v11, %v496_v2 }
 0x168   : > { %500 = vst [vmem:[#allocation2 + $0x30] sm:$0x3] %v498_v3 }
 0x16a   : > { %v502_v4 = vpop.permute.xlu0 %501  ;;  %v504_v5 = vpop.permute.xlu1 %503 }
 0x16b   : > { %v506_v9 = vsel %vm505_vm4, %v502_v4, %v504_v5  ;;  %v831_v12 = vld [vmem:[#allocation2 + $0x70] sm:$0xff] }
 0x16c   : > { %508 = vst [vmem:[#allocation2 + $0x30] sm:$0xc] %v506_v9  ;;  %1134 = vmatprep.subr.bf16.mxu0 %v831_v12  ;;  %1156 = vmatprep.subr.bf16.mxu1 %v831_v12 }
 0x16e   : > { %v510_v6 = vpop.permute.xlu0 %509  ;;  %v512_v8 = vpop.permute.xlu1 %511 }
 0x16f   : > { %v514_v14 = vsel %vm513_vm5, %v510_v6, %v512_v8 }
 0x170   : > { %516 = vst [vmem:[#allocation2 + $0x30] sm:$0x30] %v514_v14 }
 0x172   : > { %v518_v15 = vpop.permute.xlu0 %517  ;;  %v520_v16 = vpop.permute.xlu1 %519 }
 0x173   : > { %v522_v17 = vsel %vm521_vm6, %v518_v15, %v520_v16 }
 0x174   : > { %524 = vst [vmem:[#allocation2 + $0x30] sm:$0xc0] %v522_v17 }
 0x176   : > { %v782_v18 = vpop.permute.xlu0 %781  ;;  %v784_v19 = vpop.permute.xlu1 %783 }
 0x177   : > { %v786_v20 = vsel %vm785_vm7, %v782_v18, %v784_v19 }
 0x178   : > { %788 = vst [vmem:[#allocation2 + $0x78] sm:$0x3] %v786_v20 }
 0x17a   : > { %v790_v21 = vpop.permute.xlu0 %789  ;;  %v792_v22 = vpop.permute.xlu1 %791 }
 0x17b   : > { %v794_v23 = vsel %vm793_vm8, %v790_v21, %v792_v22  ;;  %v823_v24 = vld [vmem:[#allocation2 + $0x30] sm:$0xff] }
 0x17c   : > { %796 = vst [vmem:[#allocation2 + $0x78] sm:$0xc] %v794_v23  ;;  %1135 = vmatpush3.bf16.msra.mxu0 %v823_v24  ;;  %1164 = vmatpush3.bf16.msra.mxu1 %v823_v24 }
 0x17e   : > { %v798_v25 = vpop.permute.xlu0 %797  ;;  %v800_v26 = vpop.permute.xlu1 %799 }
 0x17f   : > { %v802_v27 = vsel %vm801_vm9, %v798_v25, %v800_v26 }
 0x180   : > { %804 = vst [vmem:[#allocation2 + $0x78] sm:$0x30] %v802_v27 }
 0x182   : > { %v806_v28 = vpop.permute.xlu0 %805  ;;  %v808_v29 = vpop.permute.xlu1 %807 }
 0x183   : > { %v810_v30 = vsel %vm809_vm10, %v806_v28, %v808_v29 }
 0x184   : > { %812 = vst [vmem:[#allocation2 + $0x78] sm:$0xc0] %v810_v30 }
 0x186   : > { %v526_v31 = vpop.permute.xlu0 %525  ;;  %v528_v32 = vpop.permute.xlu1 %527 }
 0x187   : > { %v530_v33 = vsel %vm529_vm11, %v526_v31, %v528_v32 }
 0x188   : > { %532 = vst [vmem:[#allocation2 + $0x38] sm:$0x3] %v530_v33 }
 0x18a   : > { %v534_v34 = vpop.permute.xlu0 %533  ;;  %v536_v35 = vpop.permute.xlu1 %535 }
 0x18b   : > { %v538_v36 = vsel %vm537_vm12, %v534_v34, %v536_v35  ;;  %v832_v37 = vld [vmem:[#allocation2 + $0x78] sm:$0xff] }
 0x18c   : > { %540 = vst [vmem:[#allocation2 + $0x38] sm:$0xc] %v538_v36  ;;  %1136 = vmatprep.subr.bf16.mxu0 %v832_v37  ;;  %1157 = vmatprep.subr.bf16.mxu1 %v832_v37 }
 0x18e   : > { %v542_v38 = vpop.permute.xlu0 %541  ;;  %v544_v39 = vpop.permute.xlu1 %543 }
 0x18f   : > { %v546_v40 = vsel %vm545_vm13, %v542_v38, %v544_v39 }
 0x190   : > { %548 = vst [vmem:[#allocation2 + $0x38] sm:$0x30] %v546_v40 }
 0x192   : > { %v550_v41 = vpop.permute.xlu0 %549  ;;  %v552_v42 = vpop.permute.xlu1 %551 }
 0x193   : > { %v554_v43 = vsel %vm553_vm14, %v550_v41, %v552_v42 }
 0x194   : > { %556 = vst [vmem:[#allocation2 + $0x38] sm:$0xc0] %v554_v43 }
 0x19b   : > { %v824_v44 = vld [vmem:[#allocation2 + $0x38] sm:$0xff] }
 0x19c   : > { %1137 = vmatpush3.bf16.msra.mxu0 %v824_v44  ;;  %1165 = vmatpush3.bf16.msra.mxu1 %v824_v44 }
 0x19f   : > { %910 = vmatmul.mubr.bf16.vlgmr.msra.gmra.mrb[0].mxu0 %v1269_v45  ;;  %918 = vmatmul.mubr.bf16.vlgmr.msra.gmra.mrb[0].mxu1 %v1272_v46 }
 0x1a3   : > { %v845_v47 = vpop.permute.xlu1 %844  ;;  %v840_v48 = vpop.permute.xlu0 %839 }
 0x1a7   : > { %v850_v49 = vpop.permute.xlu1 %849  ;;  %v855_v50 = vpop.permute.xlu0 %854 }
 0x1ac   : > { %v937_v51 = vpop.permute.xlu1 %936  ;;  %v942_v52 = vpop.permute.xlu0 %941 }
 0x1b0   : > { %v947_v3 = vpop.permute.xlu1 %946  ;;  %v952_v6 = vpop.permute.xlu0 %951 }
 0x1b4   : > { %v986_v25 = vpop.permute.xlu1 %985 }
 0x1b5   : > { %v988_v34 = vrot.slane %v986_v25, 2  ;;  %v987_v39 = vrot.slane %v986_v25, 1  ;;  %v989_v40 = vrot.slane %v986_v25, 3 }
 0x272   : > { %v1138_v53 = vpop.f32.mrb[0].mxu0  ;;  %v1144_v54 = vpop.f32.mrb[0].mxu1 }
 0x273   : > { %v1139_v55 = vpop.f32.mrb[1].mxu0  ;;  %v1145_v56 = vpop.f32.mrb[1].mxu1 }
 0x274   : > { %v1140_v57 = vadd.f32 %v1139_v55, %v1138_v53  ;;  %v1146_v58 = vadd.f32 %v1145_v56, %v1144_v54  ;;  %v1141_v59 = vpop.f32.mrb[2].mxu0  ;;  %v1147_v60 = vpop.f32.mrb[2].mxu1 }
 0x275   : > { %v1142_v61 = vpop.f32.mrb[3].mxu0  ;;  %v1148_v62 = vpop.f32.mrb[3].mxu1 }
 0x276   : > { %v912_v10 = vadd.f32 %v1140_v57, %v840_v48  ;;  %v920_v13 = vadd.f32 %v1146_v58, %v850_v49  ;;  %v1143_v63 = vadd.f32 %v1142_v61, %v1141_v59  ;;  %v1149_v0 = vadd.f32 %v1148_v62, %v1147_v60 }
 0x277   : > { %v1016_v59 = vstv %s1015_s11  ;;  %v1020_v60 = vstv %s1019_s12 }
 0x278   : > { %v926_v1 = vmax.f32 %v912_v10, 0.0  ;;  %v928_v7 = vmax.f32 %v920_v13, 0.0  ;;  %v915_v11 = vadd.f32 %v1143_v63, %v845_v47  ;;  %v923_v2 = vadd.f32 %v1149_v0, %v855_v50 }
 0x279   : > { %v1025_v13 = vstv %s1024_s14 }
 0x27a   : > { %v954_v4 = vmul.f32 %v937_v51, %v926_v1  ;;  %v956_v5 = vmul.f32 %v947_v3, %v928_v7  ;;  %v927_v9 = vmax.f32 %v915_v11, 0.0  ;;  %v929_v12 = vmax.f32 %v923_v2, 0.0 }
 0x27b   : > { %v1030_v7 = vstv %s1029_s15 }
 0x27c   : > { %v958_v8 = vrot.slane %v954_v4, 4  ;;  %v970_v14 = vrot.slane %v956_v5, 4  ;;  %v955_v15 = vmul.f32 %v942_v52, %v927_v9  ;;  %v957_v16 = vmul.f32 %v952_v6, %v929_v12 }
 0x27e   : > { %v959_v17 = vadd.f32 %v958_v8, %v954_v4  ;;  %v971_v18 = vadd.f32 %v970_v14, %v956_v5  ;;  %v964_v19 = vrot.slane %v955_v15, 4  ;;  %v976_v20 = vrot.slane %v957_v16, 4 }
 0x280   : > { %v960_v21 = vrot.slane %v959_v17, 2  ;;  %v972_v22 = vrot.slane %v971_v18, 2  ;;  %v965_v23 = vadd.f32 %v964_v19, %v955_v15  ;;  %v977_v24 = vadd.f32 %v976_v20, %v957_v16 }
 0x282   : > { %v961_v26 = vadd.f32 %v960_v21, %v959_v17  ;;  %v973_v27 = vadd.f32 %v972_v22, %v971_v18  ;;  %v966_v28 = vrot.slane %v965_v23, 2  ;;  %v978_v29 = vrot.slane %v977_v24, 2 }
 0x284   : > { %v962_v30 = vrot.slane %v961_v26, 1  ;;  %v974_v31 = vrot.slane %v973_v27, 1  ;;  %v967_v32 = vadd.f32 %v966_v28, %v965_v23  ;;  %v979_v33 = vadd.f32 %v978_v29, %v977_v24 }
 0x286   : > { %v963_v35 = vadd.f32 %v962_v30, %v961_v26  ;;  %v975_v36 = vadd.f32 %v974_v31, %v973_v27  ;;  %v968_v37 = vrot.slane %v967_v32, 1  ;;  %v980_v38 = vrot.slane %v979_v33, 1 }
 0x288   : > { %v994_v41 = vadd.f32 %v986_v25, %v963_v35  ;;  %v996_v42 = vadd.f32 %v988_v34, %v975_v36  ;;  %v969_v43 = vadd.f32 %v968_v37, %v967_v32  ;;  %v981_v44 = vadd.f32 %v980_v38, %v979_v33 }
 0x28a   : > { %v998_v45 = vmul.f32 0.5, %v994_v41  ;;  %v1000_v46 = vmul.f32 0.5, %v996_v42  ;;  %v995_v47 = vadd.f32 %v987_v39, %v969_v43  ;;  %v997_v48 = vadd.f32 %v989_v40, %v981_v44 }
 0x28c   : > { %1275 = vtanh.f32 %v998_v45  ;;  %v999_v49 = vmul.f32 0.5, %v995_v47  ;;  %v1001_v50 = vmul.f32 0.5, %v997_v48 }
 0x28d   : > { %1277 = vtanh.f32 %v1000_v46 }
 0x28e   : > { %1279 = vtanh.f32 %v999_v49 }
 0x28f   : > { %1281 = vtanh.f32 %v1001_v50 }
 0x296   : > { %v1276_v51 = vpop.eup %1275 }
 0x297   : > { %v1278_v52 = vpop.eup %1277  ;;  %v1006_v53 = vadd.f32 1.0, %v1276_v51 }
 0x298   : > { %v1280_v54 = vpop.eup %1279  ;;  %v1008_v55 = vadd.f32 1.0, %v1278_v52 }
 0x299   : > { %v1282_v56 = vpop.eup %1281  ;;  %v1010_v57 = vmul.f32 0.5, %v1006_v53  ;;  %v1007_v58 = vadd.f32 1.0, %v1280_v54 }
 0x29a   : > { %v1009_v61 = vadd.f32 1.0, %v1282_v56  ;;  %v1012_v62 = vmul.f32 0.5, %v1008_v55 }
 0x29b   : > { %v1011_v10 = vmul.f32 0.5, %v1007_v58  ;;  %v1017_v63 = vmul.f32 %v1016_v59, %v1010_v57 }
 0x29c   : > { %v1013_v1 = vmul.f32 0.5, %v1009_v61  ;;  %v1026_v11 = vmul.f32 %v1025_v13, %v1012_v62 }
 0x29d   : > { %v1021_v0 = vmul.f32 %v1020_v60, %v1011_v10 }
 0x29e   : > { %v1031_v4 = vmul.f32 %v1030_v7, %v1013_v1 }
 0x29f   : > { %v1022_v2 = vadd.f32 %v1021_v0, %v1017_v63 }
 0x2a1   : > { %v1027_v3 = vadd.f32 %v1026_v11, %v1022_v2 }
 0x2a3   : > { %v1032_v5 = vadd.f32 %v1031_v4, %v1027_v3 }
 0x2a5   : > { %1033 = vst [vmem:[%s284_s17] sm:$0x1] %v1032_v5 }
 0x2a6 PF: > { %s17_s23 = sadd.s32 1, %s1324_s23   ;;  %s1685_s21 = smov %s1320_s22 }
 0x2a7   : > { %p14_p2 = scmp.ge.s32.totalorder %s17_s23, 4   ;;  %s1686_s22 = smov %s1688_s25 }
 0x2a9   :  { %16 = sbr.rel (!%p14_p2) target bundleno = 2 (0x2), region = 79 }
 0x2b0   :  { %1054 = vsyncpa [#allocation4], 1 }
 0x2b1   :  { %1056 = vsyncpa [#allocation4 + $0x1], 1 }

</bundles_post_ra>
